<compile_context>
chip_gen: v6e
topology: v6e:2x2x1
jax: 0.10.0
libtpu: 0.0.40
codegen_flags: <defaults>
</compile_context>

<pallas_src>
import jax
import jax.numpy as jnp
from jax.experimental import pallas as pl
from jax.experimental.pallas import tpu as pltpu

LANE = 128


def _round_up(x, m):
    return (x + m - 1) // m * m


def mlp_kernel(x_ref,
               w1_ref, b1_ref,
               w2_ref, b2_ref,
               w3_ref, b3_ref,
               w4_ref, b4_ref,
               w5_ref, b5_ref,
               o_ref):
    """Fused 5-layer MLP on one (TB, 128) batch tile."""
    h = x_ref[...]  # (TB, K_pad) f32
    hidden = ((w1_ref, b1_ref), (w2_ref, b2_ref), (w3_ref, b3_ref), (w4_ref, b4_ref))
    for w_ref, b_ref in hidden:  # unrolled at trace time
        h = jnp.dot(h.astype(jnp.bfloat16), w_ref[...],
                    preferred_element_type=jnp.float32) + b_ref[...]
        h = jnp.maximum(h, 0.0)  # f32 elementwise (v5e-friendly)
    out = jnp.dot(h.astype(jnp.bfloat16), w5_ref[...],
                  preferred_element_type=jnp.float32) + b5_ref[...]
    o_ref[...] = out.astype(o_ref.dtype)  # lane-dense (TB, 128) store


def _pick_batch_tile(b_padded8):
    """TB = 128 on v5e, 256 on v6e/v7x (MXU row depth); clamp to padded batch."""
    try:
        kind = jax.devices()[0].device_kind.lower()
    except Exception:
        kind = ""
    target = 128 if "v5" in kind else 256
    return b_padded8 if b_padded8 <= target else target


def prepare_params(params_f32, input_size):
    """Pad to lane-dense shapes (first-layer K and last-layer out -> mult of 128),
    cast weights to bf16 once host-side; biases stay f32."""
    k_pad = _round_up(input_size, LANE)
    packed = []
    n = len(params_f32)
    for i, (w, b) in enumerate(params_f32):
        fan_in, fan_out = w.shape
        in_pad = k_pad if i == 0 else fan_in
        out_pad = _round_up(fan_out, LANE) if i == n - 1 else fan_out
        w_p = jnp.zeros((in_pad, out_pad), jnp.float32).at[:fan_in, :fan_out].set(w)
        b_p = jnp.zeros((1, out_pad), jnp.float32).at[:, :fan_out].set(b)
        packed.append((w_p.astype(jnp.bfloat16), b_p))
    return packed


def basic_nn_forward(x, packed_params, output_size):
    """x: [B, input_size] f32. packed_params: from prepare_params()."""
    B, K = x.shape
    K_pad = packed_params[0][0].shape[0]
    OUT_PAD = packed_params[-1][0].shape[1]

    B8 = _round_up(B, 8)
    TB = _pick_batch_tile(B8)
    B_pad = _round_up(B, TB)

    # Zero-pad batch rows (to TB multiple) and feature cols (to 128 lanes).
    x_pad = jnp.pad(x, ((0, B_pad - B), (0, K_pad - K)))

    flat = [x_pad]
    in_specs = [pl.BlockSpec((TB, K_pad), lambda i: (i, 0))]
    for (w, b) in packed_params:
        flat.extend([w, b])
        # Weights/biases pinned at block (0, 0): Pallas keeps them VMEM-resident
        # across grid steps (block index unchanged -> no re-DMA).
        in_specs.append(pl.BlockSpec(w.shape, lambda i: (0, 0)))
        in_specs.append(pl.BlockSpec(b.shape, lambda i: (0, 0)))

    out_padded = pl.pallas_call(
        mlp_kernel,
        out_shape=jax.ShapeDtypeStruct((B_pad, OUT_PAD), jnp.float32),
        grid=(pl.cdiv(B_pad, TB),),
        in_specs=in_specs,
        out_specs=pl.BlockSpec((TB, OUT_PAD), lambda i: (i, 0)),
        compiler_params=pltpu.CompilerParams(
            dimension_semantics=("parallel",)),  # shard batch tiles across TCs (v7x)
    )(*flat)

    return out_padded[:B, :output_size]


def init_params(key, input_size, hidden_size=128, num_layers=4, output_size=3):
    """Deterministic init mimicking PyTorch Linear default U[-1/sqrt(fan_in), +]."""
    dims = [input_size] + [hidden_size] * num_layers + [output_size]
    params = []
    for i in range(len(dims) - 1):
        fan_in, fan_out = dims[i], dims[i + 1]
        key, kw, kb = jax.random.split(key, 3)
        bound = 1.0 / jnp.sqrt(fan_in)
        w = jax.random.uniform(kw, (fan_in, fan_out), jnp.float32, -bound, bound)
        b = jax.random.uniform(kb, (1, fan_out), jnp.float32, -bound, bound)
        params.append((w, b))
    return params


def reference_forward_f32(x, params):
    h = x
    for i, (w, b) in enumerate(params):
        h = h @ w + b
        if i < len(params) - 1:
            h = jnp.maximum(h, 0.0)
    return h


def reference_forward_bf16(x, params):
    """Same bf16-weight / f32-accumulate math as the kernel (tight check)."""
    h = x
    n = len(params)
    for i, (w, b) in enumerate(params):
        h = jnp.dot(h.astype(jnp.bfloat16), w.astype(jnp.bfloat16),
                    preferred_element_type=jnp.float32) + b
        if i < n - 1:
            h = jnp.maximum(h, 0.0)
    return h


if __name__ == "__main__":
    key = jax.random.PRNGKey(0)
    k_x, k_p = jax.random.split(key)

    # Small problem, but B=300 is non-aligned and exercises the batch grid
    # (multiple tiles + batch/feature/output zero-padding paths).
    B, INPUT_SIZE, HIDDEN, NUM_LAYERS, OUT = 300, 32, 128, 4, 3

    x = jax.random.normal(k_x, (B, INPUT_SIZE), jnp.float32)
    params = init_params(k_p, INPUT_SIZE, HIDDEN, NUM_LAYERS, OUT)
    packed = prepare_params(params, INPUT_SIZE)

    y = basic_nn_forward(x, packed, OUT)
    y = jax.block_until_ready(y)
    assert y.shape == (B, OUT), y.shape

    # Tight check vs a reference that does the identical bf16-weight math.
    y_bf16 = reference_forward_bf16(x, params)
    assert jnp.allclose(y, y_bf16, atol=2e-3, rtol=2e-3), "mismatch vs bf16 reference"

    # Semantics check vs the f32 PyTorch-equivalent forward (bf16 tolerance).
    y_f32 = reference_forward_f32(x, params)
    assert jnp.allclose(y, y_f32, atol=5e-2, rtol=5e-2), "mismatch vs f32 reference"

    print("KERNEL_OK")
</pallas_src>

<mosaic_0001>
module attributes {stable_mosaic.version = 11 : i64} {
  func.func @mlp_kernel(%arg0: i32, %arg1: memref<256x128xf32, #tpu.memory_space<vmem>>, %arg2: memref<128x128xbf16, #tpu.memory_space<vmem>>, %arg3: memref<1x128xf32, #tpu.memory_space<vmem>>, %arg4: memref<128x128xbf16, #tpu.memory_space<vmem>>, %arg5: memref<1x128xf32, #tpu.memory_space<vmem>>, %arg6: memref<128x128xbf16, #tpu.memory_space<vmem>>, %arg7: memref<1x128xf32, #tpu.memory_space<vmem>>, %arg8: memref<128x128xbf16, #tpu.memory_space<vmem>>, %arg9: memref<1x128xf32, #tpu.memory_space<vmem>>, %arg10: memref<128x128xbf16, #tpu.memory_space<vmem>>, %arg11: memref<1x128xf32, #tpu.memory_space<vmem>>, %arg12: memref<256x128xf32, #tpu.memory_space<vmem>>) attributes {dimension_semantics = [#tpu.dimension_semantics<parallel>], iteration_bounds = array<i64: 2>, scalar_prefetch = 0 : i64, scratch_operands = 0 : i64, tpu.core_type = #tpu.core_type<tc>, window_params = [{transform_indices = @transform_0, window_bounds = array<i64: 256, 128>}, {pipeline_mode = #tpu.pipeline_mode<synchronous>, transform_indices = @transform_1, window_bounds = array<i64: 128, 128>}, {pipeline_mode = #tpu.pipeline_mode<synchronous>, transform_indices = @transform_2, window_bounds = array<i64: 1, 128>}, {pipeline_mode = #tpu.pipeline_mode<synchronous>, transform_indices = @transform_3, window_bounds = array<i64: 128, 128>}, {pipeline_mode = #tpu.pipeline_mode<synchronous>, transform_indices = @transform_4, window_bounds = array<i64: 1, 128>}, {pipeline_mode = #tpu.pipeline_mode<synchronous>, transform_indices = @transform_5, window_bounds = array<i64: 128, 128>}, {pipeline_mode = #tpu.pipeline_mode<synchronous>, transform_indices = @transform_6, window_bounds = array<i64: 1, 128>}, {pipeline_mode = #tpu.pipeline_mode<synchronous>, transform_indices = @transform_7, window_bounds = array<i64: 128, 128>}, {pipeline_mode = #tpu.pipeline_mode<synchronous>, transform_indices = @transform_8, window_bounds = array<i64: 1, 128>}, {pipeline_mode = #tpu.pipeline_mode<synchronous>, transform_indices = @transform_9, window_bounds = array<i64: 128, 128>}, {pipeline_mode = #tpu.pipeline_mode<synchronous>, transform_indices = @transform_10, window_bounds = array<i64: 1, 128>}, {transform_indices = @transform_11, window_bounds = array<i64: 256, 128>}]} {
    %c0 = arith.constant 0 : index
    %c0_0 = arith.constant 0 : index
    %0 = vector.load %arg1[%c0, %c0_0] : memref<256x128xf32, #tpu.memory_space<vmem>>, vector<256x128xf32>
    %1 = arith.truncf %0 : vector<256x128xf32> to vector<256x128xbf16>
    %c0_1 = arith.constant 0 : index
    %c0_2 = arith.constant 0 : index
    %2 = vector.load %arg2[%c0_1, %c0_2] : memref<128x128xbf16, #tpu.memory_space<vmem>>, vector<128x128xbf16>
    %cst = arith.constant dense<0.000000e+00> : vector<256x128xf32>
    %3 = tpu.matmul %1, %2, %cst {dimension_numbers = #tpu.dot_dimension_numbers<[1], [0], [0], [1], [0, 0, 1, 1], [], []>} : vector<256x128xbf16>, vector<128x128xbf16>, vector<256x128xf32> -> vector<256x128xf32>
    %c0_3 = arith.constant 0 : index
    %c0_4 = arith.constant 0 : index
    %4 = vector.load %arg3[%c0_3, %c0_4] : memref<1x128xf32, #tpu.memory_space<vmem>>, vector<1x128xf32>
    %5 = vector.broadcast %4 : vector<1x128xf32> to vector<256x128xf32>
    %6 = arith.addf %3, %5 : vector<256x128xf32>
    %cst_5 = arith.constant 0.000000e+00 : f32
    %7 = vector.broadcast %cst_5 : f32 to vector<256x128xf32>
    %8 = arith.maximumf %6, %7 : vector<256x128xf32>
    %9 = arith.truncf %8 : vector<256x128xf32> to vector<256x128xbf16>
    %c0_6 = arith.constant 0 : index
    %c0_7 = arith.constant 0 : index
    %10 = vector.load %arg4[%c0_6, %c0_7] : memref<128x128xbf16, #tpu.memory_space<vmem>>, vector<128x128xbf16>
    %cst_8 = arith.constant dense<0.000000e+00> : vector<256x128xf32>
    %11 = tpu.matmul %9, %10, %cst_8 {dimension_numbers = #tpu.dot_dimension_numbers<[1], [0], [0], [1], [0, 0, 1, 1], [], []>} : vector<256x128xbf16>, vector<128x128xbf16>, vector<256x128xf32> -> vector<256x128xf32>
    %c0_9 = arith.constant 0 : index
    %c0_10 = arith.constant 0 : index
    %12 = vector.load %arg5[%c0_9, %c0_10] : memref<1x128xf32, #tpu.memory_space<vmem>>, vector<1x128xf32>
    %13 = vector.broadcast %12 : vector<1x128xf32> to vector<256x128xf32>
    %14 = arith.addf %11, %13 : vector<256x128xf32>
    %cst_11 = arith.constant 0.000000e+00 : f32
    %15 = vector.broadcast %cst_11 : f32 to vector<256x128xf32>
    %16 = arith.maximumf %14, %15 : vector<256x128xf32>
    %17 = arith.truncf %16 : vector<256x128xf32> to vector<256x128xbf16>
    %c0_12 = arith.constant 0 : index
    %c0_13 = arith.constant 0 : index
    %18 = vector.load %arg6[%c0_12, %c0_13] : memref<128x128xbf16, #tpu.memory_space<vmem>>, vector<128x128xbf16>
    %cst_14 = arith.constant dense<0.000000e+00> : vector<256x128xf32>
    %19 = tpu.matmul %17, %18, %cst_14 {dimension_numbers = #tpu.dot_dimension_numbers<[1], [0], [0], [1], [0, 0, 1, 1], [], []>} : vector<256x128xbf16>, vector<128x128xbf16>, vector<256x128xf32> -> vector<256x128xf32>
    %c0_15 = arith.constant 0 : index
    %c0_16 = arith.constant 0 : index
    %20 = vector.load %arg7[%c0_15, %c0_16] : memref<1x128xf32, #tpu.memory_space<vmem>>, vector<1x128xf32>
    %21 = vector.broadcast %20 : vector<1x128xf32> to vector<256x128xf32>
    %22 = arith.addf %19, %21 : vector<256x128xf32>
    %cst_17 = arith.constant 0.000000e+00 : f32
    %23 = vector.broadcast %cst_17 : f32 to vector<256x128xf32>
    %24 = arith.maximumf %22, %23 : vector<256x128xf32>
    %25 = arith.truncf %24 : vector<256x128xf32> to vector<256x128xbf16>
    %c0_18 = arith.constant 0 : index
    %c0_19 = arith.constant 0 : index
    %26 = vector.load %arg8[%c0_18, %c0_19] : memref<128x128xbf16, #tpu.memory_space<vmem>>, vector<128x128xbf16>
    %cst_20 = arith.constant dense<0.000000e+00> : vector<256x128xf32>
    %27 = tpu.matmul %25, %26, %cst_20 {dimension_numbers = #tpu.dot_dimension_numbers<[1], [0], [0], [1], [0, 0, 1, 1], [], []>} : vector<256x128xbf16>, vector<128x128xbf16>, vector<256x128xf32> -> vector<256x128xf32>
    %c0_21 = arith.constant 0 : index
    %c0_22 = arith.constant 0 : index
    %28 = vector.load %arg9[%c0_21, %c0_22] : memref<1x128xf32, #tpu.memory_space<vmem>>, vector<1x128xf32>
    %29 = vector.broadcast %28 : vector<1x128xf32> to vector<256x128xf32>
    %30 = arith.addf %27, %29 : vector<256x128xf32>
    %cst_23 = arith.constant 0.000000e+00 : f32
    %31 = vector.broadcast %cst_23 : f32 to vector<256x128xf32>
    %32 = arith.maximumf %30, %31 : vector<256x128xf32>
    %33 = arith.truncf %32 : vector<256x128xf32> to vector<256x128xbf16>
    %c0_24 = arith.constant 0 : index
    %c0_25 = arith.constant 0 : index
    %34 = vector.load %arg10[%c0_24, %c0_25] : memref<128x128xbf16, #tpu.memory_space<vmem>>, vector<128x128xbf16>
    %cst_26 = arith.constant dense<0.000000e+00> : vector<256x128xf32>
    %35 = tpu.matmul %33, %34, %cst_26 {dimension_numbers = #tpu.dot_dimension_numbers<[1], [0], [0], [1], [0, 0, 1, 1], [], []>} : vector<256x128xbf16>, vector<128x128xbf16>, vector<256x128xf32> -> vector<256x128xf32>
    %c0_27 = arith.constant 0 : index
    %c0_28 = arith.constant 0 : index
    %36 = vector.load %arg11[%c0_27, %c0_28] : memref<1x128xf32, #tpu.memory_space<vmem>>, vector<1x128xf32>
    %37 = vector.broadcast %36 : vector<1x128xf32> to vector<256x128xf32>
    %38 = arith.addf %35, %37 : vector<256x128xf32>
    %c0_29 = arith.constant 0 : index
    %c0_30 = arith.constant 0 : index
    %39 = vector.load %arg12[%c0_29, %c0_30] : memref<256x128xf32, #tpu.memory_space<vmem>>, vector<256x128xf32>
    tpu.vector_store %arg12[%c0_29, %c0_30], %38 {strides = array<i32>} : memref<256x128xf32, #tpu.memory_space<vmem>>, vector<256x128xf32>,
    return
  }
  func.func @transform_0(%arg0: i32) -> (i32, i32) {
    %c0_i32 = arith.constant 0 : i32
    %c0_i32_0 = arith.constant 0 : i32
    return %arg0, %c0_i32 : i32, i32
  }
  func.func @transform_1(%arg0: i32) -> (i32, i32) {
    %c0_i32 = arith.constant 0 : i32
    %c0_i32_0 = arith.constant 0 : i32
    %c0_i32_1 = arith.constant 0 : i32
    return %c0_i32, %c0_i32_0 : i32, i32
  }
  func.func @transform_2(%arg0: i32) -> (i32, i32) {
    %c0_i32 = arith.constant 0 : i32
    %c0_i32_0 = arith.constant 0 : i32
    %c0_i32_1 = arith.constant 0 : i32
    return %c0_i32, %c0_i32_0 : i32, i32
  }
  func.func @transform_3(%arg0: i32) -> (i32, i32) {
    %c0_i32 = arith.constant 0 : i32
    %c0_i32_0 = arith.constant 0 : i32
    %c0_i32_1 = arith.constant 0 : i32
    return %c0_i32, %c0_i32_0 : i32, i32
  }
  func.func @transform_4(%arg0: i32) -> (i32, i32) {
    %c0_i32 = arith.constant 0 : i32
    %c0_i32_0 = arith.constant 0 : i32
    %c0_i32_1 = arith.constant 0 : i32
    return %c0_i32, %c0_i32_0 : i32, i32
  }
  func.func @transform_5(%arg0: i32) -> (i32, i32) {
    %c0_i32 = arith.constant 0 : i32
    %c0_i32_0 = arith.constant 0 : i32
    %c0_i32_1 = arith.constant 0 : i32
    return %c0_i32, %c0_i32_0 : i32, i32
  }
  func.func @transform_6(%arg0: i32) -> (i32, i32) {
    %c0_i32 = arith.constant 0 : i32
    %c0_i32_0 = arith.constant 0 : i32
    %c0_i32_1 = arith.constant 0 : i32
    return %c0_i32, %c0_i32_0 : i32, i32
  }
  func.func @transform_7(%arg0: i32) -> (i32, i32) {
    %c0_i32 = arith.constant 0 : i32
    %c0_i32_0 = arith.constant 0 : i32
    %c0_i32_1 = arith.constant 0 : i32
    return %c0_i32, %c0_i32_0 : i32, i32
  }
  func.func @transform_8(%arg0: i32) -> (i32, i32) {
    %c0_i32 = arith.constant 0 : i32
    %c0_i32_0 = arith.constant 0 : i32
    %c0_i32_1 = arith.constant 0 : i32
    return %c0_i32, %c0_i32_0 : i32, i32
  }
  func.func @transform_9(%arg0: i32) -> (i32, i32) {
    %c0_i32 = arith.constant 0 : i32
    %c0_i32_0 = arith.constant 0 : i32
    %c0_i32_1 = arith.constant 0 : i32
    return %c0_i32, %c0_i32_0 : i32, i32
  }
  func.func @transform_10(%arg0: i32) -> (i32, i32) {
    %c0_i32 = arith.constant 0 : i32
    %c0_i32_0 = arith.constant 0 : i32
    %c0_i32_1 = arith.constant 0 : i32
    return %c0_i32, %c0_i32_0 : i32, i32
  }
  func.func @transform_11(%arg0: i32) -> (i32, i32) {
    %c0_i32 = arith.constant 0 : i32
    %c0_i32_0 = arith.constant 0 : i32
    return %arg0, %c0_i32 : i32, i32
  }
}

</mosaic_0001>

<bundles_post_ra>
// kernel: tpu_custom_call.1
= control target key start
LH: loop header
LB: loop body
LE: loop exit
PB: predicated region body
PF: predicated region fallthrough
CT: control target
= control target key end

     0   :  { %s3466_s0 = inlined_call_operand.hbm [shape: f32[512,128], index: 0, kind: input, shape index: {}]   ;;  %s3467_s1 = inlined_call_operand.hbm [shape: bf16[128,128], index: 1, kind: input, shape index: {}]   ;;  %s3468_s2 = inlined_call_operand.vmem [shape: f32[1,128], index: 2, kind: input, shape index: {}]   ;;  %s3469_s3 = inlined_call_operand.hbm [shape: bf16[128,128], index: 3, kind: input, shape index: {}]   ;;  %s3470_s4 = inlined_call_operand.vmem [shape: f32[1,128], index: 4, kind: input, shape index: {}]   ;;  %s3471_s5 = inlined_call_operand.hbm [shape: bf16[128,128], index: 5, kind: input, shape index: {}]   ;;  %s3472_s6 = inlined_call_operand.vmem [shape: f32[1,128], index: 6, kind: input, shape index: {}]   ;;  %s3473_s7 = inlined_call_operand.hbm [shape: bf16[128,128], index: 7, kind: input, shape index: {}]   ;;  %s3474_s8 = inlined_call_operand.vmem [shape: f32[1,128], index: 8, kind: input, shape index: {}]   ;;  %s3475_s9 = inlined_call_operand.hbm [shape: bf16[128,128], index: 9, kind: input, shape index: {}]   ;;  %s3476_s10 = inlined_call_operand.vmem [shape: f32[1,128], index: 10, kind: input, shape index: {}]   ;;  %s3477_s11 = inlined_call_operand.hbm [shape: f32[512,128], index: 11, kind: output, shape index: {}]  }
   0x1   :  { %3482 = sst [smem:[#allocation19_spill]] %s3467_s1 }
   0x2   :  { %3483 = sst [smem:[#allocation20_spill]] %s3469_s3 }
   0x3   :  { %3484 = sst [smem:[#allocation21_spill]] %s3471_s5 }
   0x4   :  { %3485 = sst [smem:[#allocation22_spill]] %s3473_s7 }
   0x5   :  { %3486 = sst [smem:[#allocation23_spill]] %s3475_s9 }
   0x6   :  { %16 = vsyncpa [#allocation3], 0 }
   0x7   :  { %18 = vsyncpa [#allocation3 + $0x1], 0 }
   0x8   :  { %19 = vsyncpa [#allocation6], 0 }
   0x9   :  { %20 = vsyncpa [#allocation9], 0 }
   0xa   :  { %21 = vsyncpa [#allocation12], 0 }
   0xb   :  { %22 = vsyncpa [#allocation4], 0 }
   0xc   :  { %24 = vsyncpa [#allocation4 + $0x1], 0  ;;  %s2947_s17 = smov 0   ;;  %s2949_s18 = smov 0  }
   0xd   :  { %s2951_s19 = smov 0   ;;  %s2953_s20 = smov 0  }
   0xe LB: > { %s2874_s21 = smov [#allocation5]   ;;  %s2968_s23 = sadd.s32 4294967295, %s2872_s20   ;;  %s2872_s20 = sphi %s2953_s20, %s3513_s20   ;;  %s2868_s19 = sphi %s2951_s19, %s3512_s19   ;;  %s2864_s18 = sphi %s2949_s18, %s3511_s18   ;;  %s2860_s17 = sphi %s2947_s17, %s3510_s17  }
   0xf   : > { %s309_s22 = sshll.u32 %s2874_s21, 4  ;;  %p2049_p0 = scmp.ge.s32.totalorder %s2872_s20, 1  ;;  %s310_s22 = int_to_ptr.vmem [resolvable:$true] %s309_s22 }
  0x10   : > { %p3478_p1 = scmp.eq.s32.totalorder %s2968_s23, 0  ;;  %p297_p2 = scmp.lt.s32.totalorder %s2872_s20, 3 }
  0x11   : > { %s2875_s25 = smov [#allocation8]   ;;  %s2876_s28 = smov [#allocation7]  }
  0x12   : > { %p2973_p3 = pnand %p2049_p0, %p297_p2  ;;  %s341_s26 = sshll.u32 %s2875_s25, 4  ;;  %s2986_s26 = int_to_ptr.vmem [resolvable:$true] %s341_s26 }
  0x13   : > { %s325_s29 = sshll.u32 %s2876_s28, 4  ;;  %s2649_s12 = scalar_lea.vmem %s310_s22, 1024  ;;  %s2988_s29 = int_to_ptr.vmem [resolvable:$true] %s325_s29 }
  0x14   : > { %s3487_s24 = scalar_select %p2973_p3, 1, 0 }
  0x15   : > { %p2519_p5 = pneg %p2973_p3  ;;  %p2650_p8 = scmp.ne.s32.totalorder %s310_s22, %s2649_s12 }
  0x16   : > { %p2657_p11 = scmp.lt.s32.totalorder %s310_s22, %s310_s22  ;;  %p2658_p12 = scmp.lt.s32.totalorder %s2649_s12, %s2649_s12 }
  0x17   : > { %p2982_p6 = pnand %p2519_p5, %p3478_p1 }
  0x18   : > { %p2659_p13 = por %p2658_p12, %p2657_p11 }
  0x19   : > { %p2992_p7 = pneg %p2982_p6 }
  0x1b   : > { %p2652_p9 = pnand %p2650_p8, %p2992_p7 }
  0x1d   : > { %p2653_p10 = pneg %p2652_p9 }
  0x1f   : > { %p2660_p0 = pnand %p2659_p13, %p2653_p10 }
  0x21   : > { %2663 = shalt.err (!%p2660_p0)
}
  0x22   : > { %s2877_s13 = smov 64   ;;  %s2878_s14 = smov 4  }
  0x23   : > { %s3490_s1 = sld [smem:[#allocation19_spill]]  ;;  %s2675_s21 = scalar_lea.vmem %s2986_s26, 1024 }
  0x24   : > { %p2676_p2 = scmp.ne.s32.totalorder %s2986_s26, %s2675_s21  ;;  %p2683_p9 = scmp.lt.s32.totalorder %s2986_s26, %s2986_s26 }
  0x25   : > { %p2684_p10 = scmp.lt.s32.totalorder %s2675_s21, %s2675_s21 }
  0x26   : > { %p2678_p5 = pnand %p2676_p2, %p2992_p7 }
  0x27   : > { %p2685_p11 = por %p2684_p10, %p2683_p9 }
  0x28   : > { %p2679_p8 = pneg %p2678_p5 }
  0x29   : > { %2522 = dma.hbm_to_vmem [thread:$0]  (!%p2982_p6), %s3490_s1, 1024, %s310_s22, [#allocation6], %s2877_s13, %s2877_s13, %s2878_s14  }
  0x2a   : > { %p2686_p12 = pnand %p2685_p11, %p2679_p8 }
  0x2c   : > { %2689 = shalt.err (!%p2686_p12)
}
  0x2d   : > { %s3491_s5 = sld [smem:[#allocation21_spill]]  ;;  %s2701_s22 = scalar_lea.vmem %s2988_s29, 1024 }
  0x2e   : > { %p2702_p13 = scmp.ne.s32.totalorder %s2988_s29, %s2701_s22  ;;  %p2709_p5 = scmp.lt.s32.totalorder %s2988_s29, %s2988_s29 }
  0x2f   : > { %p2710_p8 = scmp.lt.s32.totalorder %s2701_s22, %s2701_s22 }
  0x30   : > { %p2704_p0 = pnand %p2702_p13, %p2992_p7 }
  0x31   : > { %p2711_p9 = por %p2710_p8, %p2709_p5 }
  0x32   : > { %p2705_p2 = pneg %p2704_p0 }
  0x33   : > { %2528 = dma.hbm_to_vmem [thread:$0]  (!%p2982_p6), %s3491_s5, 1024, %s2986_s26, [#allocation9], %s2877_s13, %s2877_s13, %s2878_s14  }
  0x34   : > { %p2712_p10 = pnand %p2711_p9, %p2705_p2 }
  0x36   : > { %2715 = shalt.err (!%p2712_p10)
}
  0x37   : > { %s3492_s3 = sld [smem:[#allocation20_spill]]  ;;  %s2879_s26 = smov [#allocation10]  }
  0x38   : > { %s357_s16 = sshll.u32 %s2879_s26, 4  ;;  %s2880_s21 = smov [#allocation11]   ;;  %s358_s16 = int_to_ptr.vmem [resolvable:$true] %s357_s16 }
  0x39   : > { %s373_s25 = sshll.u32 %s2880_s21, 4  ;;  %s2727_s28 = scalar_lea.vmem %s358_s16, 1024  ;;  %s374_s25 = int_to_ptr.vmem [resolvable:$true] %s373_s25 }
  0x3a   : > { %p2728_p11 = scmp.ne.s32.totalorder %s358_s16, %s2727_s28  ;;  %p2735_p0 = scmp.lt.s32.totalorder %s358_s16, %s358_s16 }
  0x3b   : > { %p2736_p2 = scmp.lt.s32.totalorder %s2727_s28, %s2727_s28 }
  0x3c   : > { %p2730_p12 = pnand %p2728_p11, %p2992_p7 }
  0x3d   : > { %2525 = dma.hbm_to_vmem [thread:$0]  (!%p2982_p6), %s3492_s3, 1024, %s2988_s29, [#allocation6], %s2877_s13, %s2877_s13, %s2878_s14  }
  0x3e   : > { %p2731_p13 = pneg %p2730_p12  ;;  %p2737_p5 = por %p2736_p2, %p2735_p0 }
  0x40   : > { %p2738_p8 = pnand %p2737_p5, %p2731_p13 }
  0x42   : > { %2741 = shalt.err (!%p2738_p8)
}
  0x43   : > { %s3493_s7 = sld [smem:[#allocation22_spill]]  ;;  %s2753_s12 = scalar_lea.vmem %s374_s25, 1024 }
  0x44   : > { %p2754_p9 = scmp.ne.s32.totalorder %s374_s25, %s2753_s12  ;;  %p2761_p12 = scmp.lt.s32.totalorder %s374_s25, %s374_s25 }
  0x45   : > { %p2762_p0 = scmp.lt.s32.totalorder %s2753_s12, %s2753_s12 }
  0x46   : > { %p2756_p10 = pnand %p2754_p9, %p2992_p7 }
  0x47   : > { %p2763_p13 = por %p2762_p0, %p2761_p12 }
  0x48   : > { %p2757_p11 = pneg %p2756_p10 }
  0x49   : > { %2531 = dma.hbm_to_vmem [thread:$0]  (!%p2982_p6), %s3493_s7, 1024, %s358_s16, [#allocation9], %s2877_s13, %s2877_s13, %s2878_s14  }
  0x4a   : > { %p2764_p2 = pnand %p2763_p13, %p2757_p11 }
  0x4c   : > { %2767 = shalt.err (!%p2764_p2)
}
  0x4d   : > { %s3494_s9 = sld [smem:[#allocation23_spill]]  ;;  %s2048_s27 = sadd.s32 4294967294, %s2872_s20  }
  0x4e   : > { %s3058_s30 = sadd.s32 1, %s2872_s20   ;;  %s37_s16 = sadd.s32 1, %s2868_s19 }
  0x4f   : > { %s34_s21 = ssub.s32 %s2872_s20, %s3058_s30  ;;  %p44_p7 = scmp.ne.s32.totalorder %s2868_s19, %s2864_s18 }
  0x50   : > { %p35_p5 = scmp.eq.s32.totalorder %s34_s21, 0  ;;  %p45_p8 = scmp.eq.s32.totalorder %s2872_s20, 0 }
  0x51   : > { %p50_p9 = scmp.ne.s32.totalorder %s2864_s18, %s2860_s17  ;;  %p284_p10 = scmp.eq.s32.totalorder %s2968_s23, 1 }
  0x52   : > { %s3070_s28 = scalar_select %p35_p5, %s2868_s19, %s37_s16  }
  0x53   : > { %2534 = dma.hbm_to_vmem [thread:$0]  (!%p2982_p6), %s3494_s9, 1024, %s374_s25, [#allocation12], %s2877_s13, %s2877_s13, %s2878_s14  }
  0x54   : > { %p46_p11 = por %p45_p8, %p44_p7  ;;  %p3074_p12 = por %p3478_p1, %p50_p9 }
  0x55   : > { %p3078_p6 = por %p284_p10, %p44_p7  ;;  %p290_p0 = scmp.eq.s32.totalorder %s2048_s27, 1 }
  0x56   : > { %s3495_s29 = scalar_select %p3074_p12, 1, 0 }
  0x57   : > { %s3496_s13 = scalar_select %p3078_p6, 1, 0 }
  0x58   : > { %p2548_p13 = scmp.lt.s32.totalorder %s2872_s20, 2  ;;  %s390_s14 = sand.u32 1, %s2868_s19  }
  0x59   : > { %p3084_p2 = por %p290_p0, %p50_p9  ;;  %s2056_s22 = sshll.u32 %s390_s14, 8 }
  0x5a   : > { %s2117_s12 = sshll.u32 %s2872_s20, 12  ;;  %s394_s21 = scalar_lea.vmem [#allocation2], %s2056_s22 }
  0x5b   : > { %s3497_s25 = scalar_select %p3084_p2, 1, 0 }
  0x5c   : > { %s3092_s16 = scalar_lea.hbm %s3466_s0, %s2117_s12  ;;  %s401_s1 = sshll.u32 %s394_s21, 4  ;;  %s3098_s1 = int_to_ptr.vmem [resolvable:$true] %s401_s1 }
  0x5d   : > { %p3094_p7 = pnand %p2548_p13, %p46_p11  ;;  %s3100_s3 = scalar_lea.sflag [#allocation3], %s390_s14 }
  0x5e   : > { %s2768_s5 = scalar_lea.hbm %s3092_s16, 4096  ;;  %s2773_s22 = scalar_lea.hbm %s3466_s0, 8192 }
  0x5f   : > { %p2769_p5 = scmp.ne.s32.totalorder %s3092_s16, %s2768_s5  ;;  %p2770_p8 = pneg %p3094_p7 }
  0x60   : > { %p2774_p11 = scmp.lt.s32.totalorder %s3092_s16, %s3466_s0  ;;  %p2775_p0 = scmp.lt.s32.totalorder %s2773_s22, %s2768_s5 }
  0x61   : > { %p2771_p9 = pnand %p2770_p8, %p2769_p5 }
  0x62   : > { %p2776_p13 = por %p2775_p0, %p2774_p11 }
  0x63   : > { %p2772_p10 = pneg %p2771_p9 }
  0x65   : > { %p2777_p4 = pnand %p2776_p13, %p2772_p10 }
  0x67   : > { %2780 = shalt.err (!%p2777_p4)
}
  0x68   : > { %s2781_s14 = scalar_lea.vmem %s3098_s1, 4096  ;;  %s2881_s7 = smov [#allocation2]  }
  0x69   : > { %p2782_p1 = scmp.ne.s32.totalorder %s3098_s1, %s2781_s14  ;;  %s2786_s9 = sshll.u32 %s2881_s7, 4  ;;  %s2787_s9 = int_to_ptr.vmem [resolvable:$false] %s2786_s9 }
  0x6a   : > { %s2788_s12 = scalar_lea.vmem %s2787_s9, 8192  ;;  %p2789_p9 = scmp.lt.s32.totalorder %s3098_s1, %s2787_s9 }
  0x6b   : > { %p2784_p2 = pnand %p2782_p1, %p2770_p8  ;;  %p2790_p6 = scmp.lt.s32.totalorder %s2788_s12, %s2781_s14 }
  0x6d   : > { %p2785_p5 = pneg %p2784_p2  ;;  %p2791_p12 = por %p2790_p6, %p2789_p9 }
  0x6f   : > { %p2792_p3 = pnand %p2791_p12, %p2785_p5 }
  0x71   : > { %2795 = shalt.err (!%p2792_p3)
}
  0x72   : > { %s2882_s5 = smov 128   ;;  %s2883_s15 = smov 8  }
  0x73   : > { %2538 = dma.hbm_to_vmem [thread:$0]  (!%p3094_p7), %s3092_s16, 4096, %s3098_s1, %s3100_s3, %s2882_s5, %s2882_s5, %s2883_s15  }
  0x74   : > { %p3499_p1 = scmp.ne.s32.totalorder %s3487_s24, 0 }
  0x75   : > { %s3124_s7 = sand.u32 (!%p3499_p1), 1, %s2864_s18   ;;  %p3500_p3 = scmp.ne.s32.totalorder (!%p3499_p1), %s3495_s29, 0 }
  0x76   : > { %413 = sbr.rel (%p3499_p1) target bundleno = 1262 (0x4ee), region = 64  ;;  %s2060_s9 = sshll.u32 (!%p3499_p1), %s3124_s7, 8 }
  0x77   : > { %s416_s22 = scalar_lea.sflag (!%p3499_p1), [#allocation3], %s3124_s7  ;;  %s3130_s26 = scalar_lea.vmem (!%p3499_p1), [#allocation2], %s2060_s9 }
  0x7b   : > { %2839 = dma.done.wait (%p3500_p3), %s416_s22, 4096  }
  0x7c   : > { %2841 = vsyncadd (%p3500_p3), %s416_s22, 4294963200  ;;  %p3501_p4 = scmp.eq.s32.totalorder %s2968_s23, 0 }
  0x7e   : > { %2843 = dma.done.wait (%p3501_p4), [#allocation6], 2048   ;;  %p3502_p12 = pmov %p3501_p4 }
  0x7f   : > { %p3503_p6 = pmov %p3501_p4 }
  0x80   : > { %2845 = vsyncadd (%p3502_p12), [#allocation6], 4294965248 }
  0x81   : > { %2847 = dma.done.wait (%p3503_p6), [#allocation9], 2048   ;;  %p3504_p2 = pmov %p3501_p4 }
  0x83   : > { %2849 = vsyncadd (%p3504_p2), [#allocation9], 4294965248  ;;  %p3505_p7 = pmov %p3504_p2 }
  0x84   : > { %p3506_p8 = pmov %p3504_p2 }
  0x85   : > { %2851 = dma.done.wait (%p3505_p7), [#allocation12], 1024  }
  0x86   : > { %2853 = vsyncadd (%p3506_p8), [#allocation12], 4294966272  ;;  %v2598_v0 = vld [vmem:[#allocation5 + $0x38] sm:$0xff]   ;;  %v2599_v1 = vld [vmem:[#allocation5 + $0x30] sm:$0xff]   ;;  %s3351_s15 = scalar_lea.vmem [#allocation13], %s2060_s9  ;;  %s2118_s9 = sshll.u32 %s2968_s23, 12 }
  0x87   : > { %2239 = vmatprep.subr.bf16.mxu0 %v2598_v0  ;;  %2479 = vmatprep.subr.bf16.mxu1 %v2598_v0  ;;  %v2600_v2 = vld [vmem:[#allocation5 + $0x28] sm:$0xff]   ;;  %v2601_v3 = vld [vmem:[#allocation5 + $0x20] sm:$0xff]   ;;  %v2602_v7 = vld [vmem:[#allocation5 + $0x18] sm:$0xff]   ;;  %s1927_s22 = sshll.u32 %s3351_s15, 4  ;;  %s3418_s3 = scalar_lea.hbm %s3477_s11, %s2118_s9  ;;  %s3420_s22 = int_to_ptr.vmem [resolvable:$true] %s1927_s22 }
  0x88   : > { %2240 = vmatpush3.bf16.msra.mxu0 %v2598_v0  ;;  %2487 = vmatpush3.bf16.msra.mxu1 %v2598_v0  ;;  %v481_v4 = vld [vmem:[%s3130_s26] sm:$0xff]  ;;  %v482_v5 = vld [vmem:[%s3130_s26 + $0x8] sm:$0xff]  ;;  %v2603_v11 = vld [vmem:[#allocation5 + $0x10] sm:$0xff]   ;;  %s1914_s23 = scalar_lea.sflag [#allocation4], %s3124_s7  ;;  %s2796_s24 = scalar_lea.vmem %s3420_s22, 4096 }
  0x89   : > { %2241 = vmatprep.subr.bf16.mxu0 %v2599_v1  ;;  %2480 = vmatprep.subr.bf16.mxu1 %v2599_v1  ;;  %v513_v6 = vpack.c.bf16 %v482_v5, %v481_v4  ;;  %v497_v8 = vld [vmem:[%s3130_s26 + $0x80] sm:$0xff]  ;;  %v498_v9 = vld [vmem:[%s3130_s26 + $0x88] sm:$0xff]  ;;  %v483_v14 = vld [vmem:[%s3130_s26 + $0x10] sm:$0xff]  ;;  %p2797_p10 = scmp.ne.s32.totalorder %s3420_s22, %s2796_s24  ;;  %p3507_p11 = scmp.ne.s32.totalorder %s3496_s13, 0 }
  0x8a   : > { %v521_v10 = vpack.c.bf16 %v498_v9, %v497_v8  ;;  %v2604_v12 = vld [vmem:[#allocation5 + $0x8] sm:$0xff]   ;;  %v2605_v13 = vld [vmem:[#allocation5] sm:$0xff]   ;;  %v484_v15 = vld [vmem:[%s3130_s26 + $0x18] sm:$0xff]  ;;  %s2884_s29 = smov [#allocation13]  }
  0x8b   : > { %2255 = vmatprep.mubr.bf16.mxu0 %v513_v6  ;;  %v485_v16 = vld [vmem:[%s3130_s26 + $0x20] sm:$0xff]  ;;  %v486_v17 = vld [vmem:[%s3130_s26 + $0x28] sm:$0xff]  ;;  %v499_v18 = vld [vmem:[%s3130_s26 + $0x90] sm:$0xff]  ;;  %v514_v23 = vpack.c.bf16 %v484_v15, %v483_v14  ;;  %p2798_p0 = pnand %p2797_p10, %p3507_p11  ;;  %s2800_s16 = sshll.u32 %s2884_s29, 4  ;;  %s2801_s16 = int_to_ptr.vmem [resolvable:$false] %s2800_s16 }
  0x8c   : > { %2242 = vmatpush3.bf16.msra.mxu0 %v2599_v1  ;;  %2488 = vmatpush3.bf16.msra.mxu1 %v2599_v1  ;;  %v500_v19 = vld [vmem:[%s3130_s26 + $0x98] sm:$0xff]  ;;  %v501_v20 = vld [vmem:[%s3130_s26 + $0xa0] sm:$0xff]  ;;  %v502_v21 = vld [vmem:[%s3130_s26 + $0xa8] sm:$0xff]  ;;  %v515_v24 = vpack.c.bf16 %v486_v17, %v485_v16  ;;  %s2802_s27 = scalar_lea.vmem %s2801_s16, 8192  ;;  %p2803_p5 = scmp.lt.s32.totalorder %s3420_s22, %s2801_s16 }
  0x8d   : > { %2243 = vmatprep.subr.bf16.mxu0 %v2600_v2  ;;  %2481 = vmatprep.subr.bf16.mxu1 %v2600_v2  ;;  %v2606_v22 = vld [vmem:[#allocation7 + $0x38] sm:$0xff]   ;;  %v522_v25 = vpack.c.bf16 %v500_v19, %v499_v18  ;;  %v2607_v26 = vld [vmem:[#allocation7 + $0x30] sm:$0xff]   ;;  %v523_v27 = vpack.c.bf16 %v502_v21, %v501_v20  ;;  %v489_v30 = vld [vmem:[%s3130_s26 + $0x40] sm:$0xff]  ;;  %p2799_p13 = pneg %p2798_p0  ;;  %p2804_p9 = scmp.lt.s32.totalorder %s2802_s27, %s2796_s24 }
  0x8e   : > { %2271 = vmatprep.mubr.bf16.mxu1 %v521_v10  ;;  %v487_v28 = vld [vmem:[%s3130_s26 + $0x30] sm:$0xff]  ;;  %v488_v29 = vld [vmem:[%s3130_s26 + $0x38] sm:$0xff]  ;;  %v490_v31 = vld [vmem:[%s3130_s26 + $0x48] sm:$0xff] }
  0x8f   : > { %v503_v32 = vld [vmem:[%s3130_s26 + $0xb0] sm:$0xff]  ;;  %v504_v33 = vld [vmem:[%s3130_s26 + $0xb8] sm:$0xff]  ;;  %v505_v34 = vld [vmem:[%s3130_s26 + $0xc0] sm:$0xff]  ;;  %v516_v37 = vpack.c.bf16 %v488_v29, %v487_v28  ;;  %v517_v38 = vpack.c.bf16 %v490_v31, %v489_v30  ;;  %p2805_p1 = por %p2804_p9, %p2803_p5 }
  0x90   : > { %2244 = vmatpush3.bf16.msra.mxu0 %v2600_v2  ;;  %2489 = vmatpush3.bf16.msra.mxu1 %v2600_v2  ;;  %v506_v35 = vld [vmem:[%s3130_s26 + $0xc8] sm:$0xff]  ;;  %v524_v39 = vpack.c.bf16 %v504_v33, %v503_v32  ;;  %v2609_v41 = vld [vmem:[#allocation7 + $0x20] sm:$0xff]   ;;  %v491_v42 = vld [vmem:[%s3130_s26 + $0x50] sm:$0xff] }
  0x91   : > { %2245 = vmatprep.subr.bf16.mxu0 %v2601_v3  ;;  %2482 = vmatprep.subr.bf16.mxu1 %v2601_v3  ;;  %v2608_v36 = vld [vmem:[#allocation7 + $0x28] sm:$0xff]   ;;  %v525_v40 = vpack.c.bf16 %v506_v35, %v505_v34  ;;  %v492_v43 = vld [vmem:[%s3130_s26 + $0x58] sm:$0xff]  ;;  %v493_v44 = vld [vmem:[%s3130_s26 + $0x60] sm:$0xff]  ;;  %p2806_p3 = pnand %p2805_p1, %p2799_p13 }
  0x92   : > { %v494_v45 = vld [vmem:[%s3130_s26 + $0x68] sm:$0xff]  ;;  %v507_v46 = vld [vmem:[%s3130_s26 + $0xd0] sm:$0xff]  ;;  %v508_v47 = vld [vmem:[%s3130_s26 + $0xd8] sm:$0xff]  ;;  %v518_v51 = vpack.c.bf16 %v492_v43, %v491_v42 }
  0x93   : > { %v509_v48 = vld [vmem:[%s3130_s26 + $0xe0] sm:$0xff]  ;;  %v510_v49 = vld [vmem:[%s3130_s26 + $0xe8] sm:$0xff]  ;;  %v2610_v50 = vld [vmem:[#allocation7 + $0x18] sm:$0xff]   ;;  %v519_v52 = vpack.c.bf16 %v494_v45, %v493_v44  ;;  %v526_v53 = vpack.c.bf16 %v508_v47, %v507_v46 }
  0x94   : > { %2246 = vmatpush3.bf16.msra.mxu0 %v2601_v3  ;;  %2490 = vmatpush3.bf16.msra.mxu1 %v2601_v3  ;;  %v527_v54 = vpack.c.bf16 %v510_v49, %v509_v48  ;;  %v495_v55 = vld [vmem:[%s3130_s26 + $0x70] sm:$0xff]  ;;  %v496_v56 = vld [vmem:[%s3130_s26 + $0x78] sm:$0xff]  ;;  %v2612_v62 = vld [vmem:[#allocation7 + $0x8] sm:$0xff]  }
  0x95   : > { %2247 = vmatprep.subr.bf16.mxu0 %v2602_v7  ;;  %2483 = vmatprep.subr.bf16.mxu1 %v2602_v7  ;;  %v511_v57 = vld [vmem:[%s3130_s26 + $0xf0] sm:$0xff]  ;;  %v512_v58 = vld [vmem:[%s3130_s26 + $0xf8] sm:$0xff]  ;;  %v520_v59 = vpack.c.bf16 %v496_v56, %v495_v55  ;;  %v2613_v63 = vld [vmem:[#allocation7] sm:$0xff]  }
  0x96   : > { %v528_v60 = vpack.c.bf16 %v512_v58, %v511_v57  ;;  %v2611_v61 = vld [vmem:[#allocation7 + $0x10] sm:$0xff]   ;;  %v2614_v0 = vld [vmem:[#allocation8 + $0x38] sm:$0xff]   ;;  %v2616_v2 = vld [vmem:[#allocation8 + $0x28] sm:$0xff]  }
  0x97   : > { %v2615_v1 = vld [vmem:[#allocation8 + $0x30] sm:$0xff]   ;;  %v2617_v3 = vld [vmem:[#allocation8 + $0x20] sm:$0xff]   ;;  %v2618_v4 = vld [vmem:[#allocation8 + $0x18] sm:$0xff]  }
  0x98   : > { %2248 = vmatpush3.bf16.msra.mxu0 %v2602_v7  ;;  %2491 = vmatpush3.bf16.msra.mxu1 %v2602_v7  ;;  %v3185_v8 = vld [vmem:[%s3468_s2] ss:$0 sm:$0xff] }
  0x99   : > { %2249 = vmatprep.subr.bf16.mxu0 %v2603_v11  ;;  %2484 = vmatprep.subr.bf16.mxu1 %v2603_v11 }
  0x9c   : > { %2250 = vmatpush3.bf16.msra.mxu0 %v2603_v11  ;;  %2492 = vmatpush3.bf16.msra.mxu1 %v2603_v11 }
  0x9d   : > { %2251 = vmatprep.subr.bf16.mxu0 %v2604_v12  ;;  %2485 = vmatprep.subr.bf16.mxu1 %v2604_v12 }
  0xa0   : > { %2252 = vmatpush3.bf16.msra.mxu0 %v2604_v12  ;;  %2493 = vmatpush3.bf16.msra.mxu1 %v2604_v12 }
  0xa1   : > { %2253 = vmatprep.subr.bf16.mxu0 %v2605_v13  ;;  %2486 = vmatprep.subr.bf16.mxu1 %v2605_v13 }
  0xa4   : > { %2254 = vmatpush3.bf16.msra.mxu0 %v2605_v13  ;;  %2494 = vmatpush3.bf16.msra.mxu1 %v2605_v13 }
  0xa5   : > { %2287 = vmatprep.subr.bf16.mxu1 %v2606_v22  ;;  %2335 = vmatprep.subr.bf16.mxu0 %v2614_v0 }
  0xa7   : > { %2256 = vmatmul.mubr.bf16.vlgmr.msra.gmra.mxu0 %v514_v23  ;;  %2272 = vmatmul.mubr.bf16.vlgmr.msra.gmra.mxu1 %v522_v25 }
  0xa8   : > { %2259 = vmatprep.mubr.bf16.mxu0 %v515_v24  ;;  %2275 = vmatprep.mubr.bf16.mxu1 %v523_v27 }
  0xa9   : > { %2288 = vmatpush3.bf16.msra.mxu1 %v2606_v22  ;;  %2336 = vmatpush3.bf16.msra.mxu0 %v2614_v0 }
  0xaa   : > { %2289 = vmatprep.subr.bf16.mxu1 %v2607_v26  ;;  %2337 = vmatprep.subr.bf16.mxu0 %v2615_v1 }
  0xad   : > { %2290 = vmatpush3.bf16.msra.mxu1 %v2607_v26  ;;  %2338 = vmatpush3.bf16.msra.mxu0 %v2615_v1 }
  0xae   : > { %2291 = vmatprep.subr.bf16.mxu1 %v2608_v36  ;;  %2339 = vmatprep.subr.bf16.mxu0 %v2616_v2 }
  0xaf   : > { %2260 = vmatmul.mubr.bf16.gmra.mxu0 %v516_v37  ;;  %2276 = vmatmul.mubr.bf16.gmra.mxu1 %v524_v39 }
  0xb0   : > { %2263 = vmatprep.mubr.bf16.mxu0 %v517_v38  ;;  %2279 = vmatprep.mubr.bf16.mxu1 %v525_v40 }
  0xb1   : > { %2292 = vmatpush3.bf16.msra.mxu1 %v2608_v36  ;;  %2340 = vmatpush3.bf16.msra.mxu0 %v2616_v2 }
  0xb2   : > { %2293 = vmatprep.subr.bf16.mxu1 %v2609_v41  ;;  %2341 = vmatprep.subr.bf16.mxu0 %v2617_v3 }
  0xb5   : > { %2294 = vmatpush3.bf16.msra.mxu1 %v2609_v41  ;;  %2342 = vmatpush3.bf16.msra.mxu0 %v2617_v3 }
  0xb6   : > { %2295 = vmatprep.subr.bf16.mxu1 %v2610_v50  ;;  %2343 = vmatprep.subr.bf16.mxu0 %v2618_v4 }
  0xb7   : > { %2264 = vmatmul.mubr.bf16.gmra.mxu0 %v518_v51  ;;  %2280 = vmatmul.mubr.bf16.gmra.mxu1 %v526_v53 }
  0xb8   : > { %2267 = vmatprep.mubr.bf16.mxu0 %v519_v52  ;;  %2283 = vmatprep.mubr.bf16.mxu1 %v527_v54 }
  0xb9   : > { %2296 = vmatpush3.bf16.msra.mxu1 %v2610_v50  ;;  %2344 = vmatpush3.bf16.msra.mxu0 %v2618_v4 }
  0xba   : > { %2297 = vmatprep.subr.bf16.mxu1 %v2611_v61 }
  0xbd   : > { %2298 = vmatpush3.bf16.msra.mxu1 %v2611_v61 }
  0xbe   : > { %2299 = vmatprep.subr.bf16.mxu1 %v2612_v62 }
  0xbf   : > { %2268 = vmatmul.mubr.bf16.gmra.mxu0 %v520_v59  ;;  %2284 = vmatmul.mubr.bf16.gmra.mxu1 %v528_v60 }
  0xc1   : > { %2300 = vmatpush3.bf16.msra.mxu1 %v2612_v62 }
  0xc2   : > { %2301 = vmatprep.subr.bf16.mxu1 %v2613_v63 }
  0xc5   : > { %2302 = vmatpush3.bf16.msra.mxu1 %v2613_v63 }
 0x167   : > { %v2257_v5 = vpop.f32.mrf.mxu0  ;;  %v3180_v6 = vpop.f32.mrf.mxu1 }
 0x168   : > { %v643_v14 = vadd.f32 %v2257_v5, %v3185_v8 }
 0x169   : > { %v634_v7 = vpop.f32.mrf.mxu0  ;;  %v698_v9 = vpop.f32.mrf.mxu1 }
 0x16a   : > { %v635_v11 = vadd.f32 %v3185_v8, %v634_v7  ;;  %v763_v23 = vmax.f32 %v643_v14, 0.0  ;;  %v699_v59 = vadd.f32 %v3185_v8, %v698_v9 }
 0x16b   : > { %v2258_v10 = vpop.f32.mrf.mxu0  ;;  %v3189_v13 = vpop.f32.mrf.mxu1 }
 0x16c   : > { %v646_v12 = vadd.f32 %v2258_v10, %v3185_v8  ;;  %v761_v20 = vmax.f32 %v635_v11, 0.0  ;;  %v777_v4 = vmax.f32 %v699_v59, 0.0  ;;  %v2623_v59 = vld [vmem:[#allocation10 + $0x30] sm:$0xff]  }
 0x16d   : > { %v637_v15 = vpop.f32.mrf.mxu0  ;;  %v701_v17 = vpop.f32.mrf.mxu1 }
 0x16e   : > { %v638_v16 = vadd.f32 %v3185_v8, %v637_v15  ;;  %v764_v18 = vmax.f32 %v646_v12, 0.0  ;;  %v702_v60 = vadd.f32 %v3185_v8, %v701_v17 }
 0x16f   : > { %v2261_v19 = vpop.f32.mrf.mxu0  ;;  %v3193_v22 = vpop.f32.mrf.mxu1 }
 0x170   : > { %v762_v21 = vmax.f32 %v638_v16, 0.0  ;;  %v794_v27 = vpack.c.bf16 %v764_v18, %v763_v23  ;;  %v659_v32 = vadd.f32 %v2261_v19, %v3185_v8  ;;  %v778_v7 = vmax.f32 %v702_v60, 0.0  ;;  %v2625_v60 = vld [vmem:[#allocation10 + $0x20] sm:$0xff]  }
 0x171   : > { %v650_v24 = vpop.f32.mrf.mxu0  ;;  %v714_v26 = vpop.f32.mrf.mxu1  ;;  %v707_v19 = vadd.f32 %v3180_v6, %v3185_v8  ;;  %v723_v6 = vadd.f32 %v3193_v22, %v3185_v8 }
 0x172   : > { %v793_v25 = vpack.c.bf16 %v762_v21, %v761_v20  ;;  %v651_v29 = vadd.f32 %v3185_v8, %v650_v24  ;;  %v767_v40 = vmax.f32 %v659_v32, 0.0  ;;  %v801_v16 = vpack.c.bf16 %v778_v7, %v777_v4 }
 0x173   : > { %v2262_v28 = vpop.f32.mrf.mxu0  ;;  %v3197_v31 = vpop.f32.mrf.mxu1  ;;  %v715_v17 = vadd.f32 %v3185_v8, %v714_v26  ;;  %v710_v21 = vadd.f32 %v3189_v13, %v3185_v8 }
 0x174   : > { %v662_v30 = vadd.f32 %v2262_v28, %v3185_v8  ;;  %2303 = vmatprep.mubr.bf16.mxu1 %v793_v25  ;;  %v765_v38 = vmax.f32 %v651_v29, 0.0  ;;  %v726_v13 = vadd.f32 %v3197_v31, %v3185_v8 }
 0x175   : > { %v653_v33 = vpop.f32.mrf.mxu0  ;;  %2304 = vmatmul.mubr.bf16.vlgmr.msra.gmra.mxu1 %v794_v27  ;;  %v717_v37 = vpop.f32.mrf.mxu1  ;;  %v781_v24 = vmax.f32 %v715_v17, 0.0  ;;  %v779_v27 = vmax.f32 %v707_v19, 0.0  ;;  %v780_v28 = vmax.f32 %v710_v21, 0.0 }
 0x176   : > { %v654_v34 = vadd.f32 %v3185_v8, %v653_v33  ;;  %v768_v35 = vmax.f32 %v662_v30, 0.0  ;;  %v718_v18 = vadd.f32 %v3185_v8, %v717_v37  ;;  %v783_v37 = vmax.f32 %v723_v6, 0.0 }
 0x177   : > { %v2265_v36 = vpop.f32.mrf.mxu0  ;;  %v3201_v45 = vpop.f32.mrf.mxu1  ;;  %v802_v33 = vpack.c.bf16 %v780_v28, %v779_v27 }
 0x178   : > { %v766_v39 = vmax.f32 %v654_v34, 0.0  ;;  %v796_v43 = vpack.c.bf16 %v768_v35, %v767_v40  ;;  %v675_v48 = vadd.f32 %v2265_v36, %v3185_v8  ;;  %v782_v25 = vmax.f32 %v718_v18, 0.0 }
 0x179   : > { %v666_v41 = vpop.f32.mrf.mxu0  ;;  %v730_v53 = vpop.f32.mrf.mxu1  ;;  %v739_v22 = vadd.f32 %v3201_v45, %v3185_v8  ;;  %v2619_v45 = vld [vmem:[#allocation8 + $0x10] sm:$0xff]  }
 0x17a   : > { %v795_v42 = vpack.c.bf16 %v766_v39, %v765_v38  ;;  %v667_v46 = vadd.f32 %v3185_v8, %v666_v41  ;;  %v771_v56 = vmax.f32 %v675_v48, 0.0  ;;  %v803_v30 = vpack.c.bf16 %v782_v25, %v781_v24  ;;  %2345 = vmatprep.subr.bf16.mxu0 %v2619_v45 }
 0x17b   : > { %v2266_v44 = vpop.f32.mrf.mxu0  ;;  %v2282_v63 = vpop.f32.mrf.mxu1  ;;  %v731_v26 = vadd.f32 %v3185_v8, %v730_v53  ;;  %v784_v38 = vmax.f32 %v726_v13, 0.0  ;;  %2346 = vmatpush3.bf16.msra.mxu0 %v2619_v45 }
 0x17c   : > { %v678_v47 = vadd.f32 %v2266_v44, %v3185_v8  ;;  %2307 = vmatprep.mubr.bf16.mxu1 %v795_v42  ;;  %v769_v54 = vmax.f32 %v667_v46, 0.0  ;;  %v742_v44 = vadd.f32 %v2282_v63, %v3185_v8  ;;  %v2628_v63 = vld [vmem:[#allocation10 + $0x8] sm:$0xff]  }
 0x17d   : > { %v669_v49 = vpop.f32.mrf.mxu0  ;;  %2308 = vmatmul.mubr.bf16.gmra.mxu1 %v796_v43  ;;  %v733_v9 = vpop.f32.mrf.mxu1  ;;  %v785_v35 = vmax.f32 %v731_v26, 0.0  ;;  %v804_v43 = vpack.c.bf16 %v784_v38, %v783_v37 }
 0x17e   : > { %v670_v50 = vadd.f32 %v3185_v8, %v669_v49  ;;  %v772_v51 = vmax.f32 %v678_v47, 0.0  ;;  %v734_v32 = vadd.f32 %v3185_v8, %v733_v9  ;;  %v787_v47 = vmax.f32 %v739_v22, 0.0 }
 0x17f   : > { %v2269_v52 = vpop.f32.mrf.mxu0  ;;  %v2285_v23 = vpop.f32.mrf.mxu1  ;;  %v788_v48 = vmax.f32 %v742_v44, 0.0 }
 0x180   : > { %v770_v55 = vmax.f32 %v670_v50, 0.0  ;;  %v798_v61 = vpack.c.bf16 %v772_v51, %v771_v56  ;;  %v691_v2 = vadd.f32 %v2269_v52, %v3185_v8  ;;  %v786_v36 = vmax.f32 %v734_v32, 0.0  ;;  %v2620_v56 = vld [vmem:[#allocation8 + $0x8] sm:$0xff]  }
 0x181   : > { %v682_v57 = vpop.f32.mrf.mxu0  ;;  %v746_v29 = vpop.f32.mrf.mxu1  ;;  %v806_v50 = vpack.c.bf16 %v788_v48, %v787_v47  ;;  %v755_v51 = vadd.f32 %v2285_v23, %v3185_v8  ;;  %2347 = vmatprep.subr.bf16.mxu0 %v2620_v56 }
 0x182   : > { %v797_v58 = vpack.c.bf16 %v770_v55, %v769_v54  ;;  %v683_v0 = vadd.f32 %v3185_v8, %v682_v57  ;;  %v775_v14 = vmax.f32 %v691_v2, 0.0  ;;  %v805_v40 = vpack.c.bf16 %v786_v36, %v785_v35  ;;  %2348 = vmatpush3.bf16.msra.mxu0 %v2620_v56  ;;  %v2621_v57 = vld [vmem:[#allocation8] sm:$0xff]  }
 0x183   : > { %v2270_v62 = vpop.f32.mrf.mxu0  ;;  %v2286_v34 = vpop.f32.mrf.mxu1  ;;  %v747_v41 = vadd.f32 %v3185_v8, %v746_v29  ;;  %v791_v53 = vmax.f32 %v755_v51, 0.0  ;;  %2349 = vmatprep.subr.bf16.mxu0 %v2621_v57  ;;  %v3235_v2 = vld [vmem:[%s3470_s4] ss:$0 sm:$0xff] }
 0x184   : > { %v694_v1 = vadd.f32 %v2270_v62, %v3185_v8  ;;  %2311 = vmatprep.mubr.bf16.mxu1 %v797_v58  ;;  %v773_v11 = vmax.f32 %v683_v0, 0.0  ;;  %v758_v52 = vadd.f32 %v2286_v34, %v3185_v8  ;;  %v2622_v58 = vld [vmem:[#allocation10 + $0x38] sm:$0xff]   ;;  %v2627_v62 = vld [vmem:[#allocation10 + $0x10] sm:$0xff]  }
 0x185   : > { %v685_v3 = vpop.f32.mrf.mxu0  ;;  %2312 = vmatmul.mubr.bf16.gmra.mxu1 %v798_v61  ;;  %v749_v39 = vpop.f32.mrf.mxu1  ;;  %v789_v31 = vmax.f32 %v747_v41, 0.0  ;;  %2383 = vmatprep.subr.bf16.mxu1 %v2622_v58  ;;  %v2626_v61 = vld [vmem:[#allocation10 + $0x18] sm:$0xff]  }
 0x186   : > { %v686_v5 = vadd.f32 %v3185_v8, %v685_v3  ;;  %v776_v10 = vmax.f32 %v694_v1, 0.0  ;;  %v750_v42 = vadd.f32 %v3185_v8, %v749_v39  ;;  %v792_v54 = vmax.f32 %v758_v52, 0.0  ;;  %2350 = vmatpush3.bf16.msra.mxu0 %v2621_v57  ;;  %2384 = vmatpush3.bf16.msra.mxu1 %v2622_v58  ;;  %v2624_v8 = vld [vmem:[#allocation10 + $0x28] sm:$0xff]  }
 0x187   : > { %2385 = vmatprep.subr.bf16.mxu1 %v2623_v59 }
 0x188   : > { %v774_v12 = vmax.f32 %v686_v5, 0.0  ;;  %v800_v20 = vpack.c.bf16 %v776_v10, %v775_v14  ;;  %v790_v46 = vmax.f32 %v750_v42, 0.0  ;;  %v808_v55 = vpack.c.bf16 %v792_v54, %v791_v53 }
 0x18a   : > { %v799_v15 = vpack.c.bf16 %v774_v12, %v773_v11  ;;  %v807_v49 = vpack.c.bf16 %v790_v46, %v789_v31  ;;  %2386 = vmatpush3.bf16.msra.mxu1 %v2623_v59 }
 0x18b   : > { %2387 = vmatprep.subr.bf16.mxu1 %v2624_v8 }
 0x18c   : > { %2315 = vmatprep.mubr.bf16.mxu1 %v799_v15 }
 0x18d   : > { %2316 = vmatmul.mubr.bf16.gmra.mxu1 %v800_v20 }
 0x18e   : > { %2319 = vmatprep.mubr.bf16.mxu1 %v801_v16  ;;  %2388 = vmatpush3.bf16.msra.mxu1 %v2624_v8 }
 0x18f   : > { %2389 = vmatprep.subr.bf16.mxu1 %v2625_v60 }
 0x192   : > { %2390 = vmatpush3.bf16.msra.mxu1 %v2625_v60 }
 0x193   : > { %2391 = vmatprep.subr.bf16.mxu1 %v2626_v61 }
 0x195   : > { %2320 = vmatmul.mubr.bf16.gmra.mxu1 %v802_v33 }
 0x196   : > { %2323 = vmatprep.mubr.bf16.mxu1 %v803_v30  ;;  %2392 = vmatpush3.bf16.msra.mxu1 %v2626_v61 }
 0x197   : > { %2393 = vmatprep.subr.bf16.mxu1 %v2627_v62 }
 0x19a   : > { %2394 = vmatpush3.bf16.msra.mxu1 %v2627_v62 }
 0x19b   : > { %2395 = vmatprep.subr.bf16.mxu1 %v2628_v63 }
 0x19d   : > { %2324 = vmatmul.mubr.bf16.gmra.mxu1 %v804_v43 }
 0x19e   : > { %2327 = vmatprep.mubr.bf16.mxu1 %v805_v40  ;;  %2396 = vmatpush3.bf16.msra.mxu1 %v2628_v63 }
 0x1a5   : > { %2328 = vmatmul.mubr.bf16.gmra.mxu1 %v806_v50 }
 0x1a6   : > { %2331 = vmatprep.mubr.bf16.mxu1 %v807_v49 }
 0x1ad   : > { %2332 = vmatmul.mubr.bf16.gmra.mxu1 %v808_v55 }
 0x235   : > { %v2305_v0 = vpop.f32.mrf.mxu1 }
 0x236   : > { %v923_v7 = vadd.f32 %v2305_v0, %v3235_v2 }
 0x237   : > { %v914_v1 = vpop.f32.mrf.mxu1 }
 0x238   : > { %v915_v4 = vadd.f32 %v3235_v2, %v914_v1  ;;  %v1043_v16 = vmax.f32 %v923_v7, 0.0 }
 0x239   : > { %v2306_v3 = vpop.f32.mrf.mxu1 }
 0x23a   : > { %v926_v5 = vadd.f32 %v2306_v3, %v3235_v2  ;;  %v1041_v14 = vmax.f32 %v915_v4, 0.0 }
 0x23b   : > { %v917_v10 = vpop.f32.mrf.mxu1 }
 0x23c   : > { %v918_v9 = vadd.f32 %v3235_v2, %v917_v10  ;;  %v1044_v11 = vmax.f32 %v926_v5, 0.0 }
 0x23d   : > { %v2309_v12 = vpop.f32.mrf.mxu1 }
 0x23e   : > { %v1042_v15 = vmax.f32 %v918_v9, 0.0  ;;  %v1074_v19 = vpack.c.bf16 %v1044_v11, %v1043_v16  ;;  %v939_v24 = vadd.f32 %v2309_v12, %v3235_v2 }
 0x23f   : > { %v930_v17 = vpop.f32.mrf.mxu1 }
 0x240   : > { %v1073_v18 = vpack.c.bf16 %v1042_v15, %v1041_v14  ;;  %v931_v21 = vadd.f32 %v3235_v2, %v930_v17  ;;  %v1047_v32 = vmax.f32 %v939_v24, 0.0 }
 0x241   : > { %v2310_v20 = vpop.f32.mrf.mxu1 }
 0x242   : > { %v942_v23 = vadd.f32 %v2310_v20, %v3235_v2  ;;  %2351 = vmatprep.mubr.bf16.mxu0 %v1073_v18  ;;  %v1045_v30 = vmax.f32 %v931_v21, 0.0 }
 0x243   : > { %v933_v25 = vpop.f32.mrf.mxu1  ;;  %2352 = vmatmul.mubr.bf16.vlgmr.msra.gmra.mxu0 %v1074_v19 }
 0x244   : > { %v934_v27 = vadd.f32 %v3235_v2, %v933_v25  ;;  %v1048_v28 = vmax.f32 %v942_v23, 0.0 }
 0x245   : > { %v2313_v29 = vpop.f32.mrf.mxu1 }
 0x246   : > { %v1046_v26 = vmax.f32 %v934_v27, 0.0  ;;  %v1076_v13 = vpack.c.bf16 %v1048_v28, %v1047_v32  ;;  %v955_v37 = vadd.f32 %v2313_v29, %v3235_v2 }
 0x247   : > { %v946_v33 = vpop.f32.mrf.mxu1 }
 0x248   : > { %v1075_v6 = vpack.c.bf16 %v1046_v26, %v1045_v30  ;;  %v947_v35 = vadd.f32 %v3235_v2, %v946_v33  ;;  %v1051_v22 = vmax.f32 %v955_v37, 0.0 }
 0x249   : > { %v2314_v34 = vpop.f32.mrf.mxu1 }
 0x24a   : > { %v958_v36 = vadd.f32 %v2314_v34, %v3235_v2  ;;  %2355 = vmatprep.mubr.bf16.mxu0 %v1075_v6  ;;  %v1049_v42 = vmax.f32 %v947_v35, 0.0 }
 0x24b   : > { %v949_v38 = vpop.f32.mrf.mxu1  ;;  %2356 = vmatmul.mubr.bf16.gmra.mxu0 %v1076_v13 }
 0x24c   : > { %v950_v39 = vadd.f32 %v3235_v2, %v949_v38  ;;  %v1052_v40 = vmax.f32 %v958_v36, 0.0 }
 0x24d   : > { %v2317_v41 = vpop.f32.mrf.mxu1 }
 0x24e   : > { %v1050_v43 = vmax.f32 %v950_v39, 0.0  ;;  %v1078_v46 = vpack.c.bf16 %v1052_v40, %v1051_v22  ;;  %v971_v50 = vadd.f32 %v2317_v41, %v3235_v2 }
 0x24f   : > { %v962_v44 = vpop.f32.mrf.mxu1 }
 0x250   : > { %v1077_v31 = vpack.c.bf16 %v1050_v43, %v1049_v42  ;;  %v963_v48 = vadd.f32 %v3235_v2, %v962_v44  ;;  %v1055_v56 = vmax.f32 %v971_v50, 0.0 }
 0x251   : > { %v2318_v47 = vpop.f32.mrf.mxu1 }
 0x252   : > { %v974_v49 = vadd.f32 %v2318_v47, %v3235_v2  ;;  %2359 = vmatprep.mubr.bf16.mxu0 %v1077_v31  ;;  %v1053_v55 = vmax.f32 %v963_v48, 0.0 }
 0x253   : > { %v965_v51 = vpop.f32.mrf.mxu1  ;;  %2360 = vmatmul.mubr.bf16.gmra.mxu0 %v1078_v46 }
 0x254   : > { %v966_v52 = vadd.f32 %v3235_v2, %v965_v51  ;;  %v1056_v53 = vmax.f32 %v974_v49, 0.0 }
 0x255   : > { %v2321_v54 = vpop.f32.mrf.mxu1 }
 0x256   : > { %v1054_v45 = vmax.f32 %v966_v52, 0.0  ;;  %v1080_v59 = vpack.c.bf16 %v1056_v53, %v1055_v56  ;;  %v987_v62 = vadd.f32 %v2321_v54, %v3235_v2  ;;  %v2629_v52 = vld [vmem:[#allocation10] sm:$0xff]   ;;  %v2630_v53 = vld [vmem:[#allocation11 + $0x38] sm:$0xff]   ;;  %v2631_v54 = vld [vmem:[#allocation11 + $0x30] sm:$0xff]  }
 0x257   : > { %v978_v57 = vpop.f32.mrf.mxu1  ;;  %2397 = vmatprep.subr.bf16.mxu1 %v2629_v52  ;;  %2431 = vmatprep.subr.bf16.mxu0 %v2630_v53  ;;  %v2635_v56 = vld [vmem:[#allocation11 + $0x10] sm:$0xff]  }
 0x258   : > { %v1079_v58 = vpack.c.bf16 %v1054_v45, %v1053_v55  ;;  %v979_v60 = vadd.f32 %v3235_v2, %v978_v57  ;;  %v1059_v7 = vmax.f32 %v987_v62, 0.0  ;;  %2398 = vmatpush3.bf16.msra.mxu1 %v2629_v52  ;;  %2432 = vmatpush3.bf16.msra.mxu0 %v2630_v53  ;;  %v2632_v55 = vld [vmem:[#allocation11 + $0x28] sm:$0xff]   ;;  %v2634_v45 = vld [vmem:[#allocation11 + $0x18] sm:$0xff]  }
 0x259   : > { %v2322_v8 = vpop.f32.mrf.mxu1  ;;  %2433 = vmatprep.subr.bf16.mxu0 %v2631_v54  ;;  %v2636_v57 = vld [vmem:[#allocation11 + $0x8] sm:$0xff]  }
 0x25a   : > { %v990_v61 = vadd.f32 %v2322_v8, %v3235_v2  ;;  %2363 = vmatprep.mubr.bf16.mxu0 %v1079_v58  ;;  %v1057_v4 = vmax.f32 %v979_v60, 0.0  ;;  %v3272_v8 = vld [vmem:[%s3472_s6] ss:$0 sm:$0xff] }
 0x25b   : > { %v981_v63 = vpop.f32.mrf.mxu1  ;;  %2364 = vmatmul.mubr.bf16.gmra.mxu0 %v1080_v59 }
 0x25c   : > { %v982_v0 = vadd.f32 %v3235_v2, %v981_v63  ;;  %v1060_v1 = vmax.f32 %v990_v61, 0.0  ;;  %2434 = vmatpush3.bf16.msra.mxu0 %v2631_v54 }
 0x25d   : > { %v2325_v3 = vpop.f32.mrf.mxu1  ;;  %2435 = vmatprep.subr.bf16.mxu0 %v2632_v55 }
 0x25e   : > { %v1058_v5 = vmax.f32 %v982_v0, 0.0  ;;  %v1082_v11 = vpack.c.bf16 %v1060_v1, %v1059_v7  ;;  %v1003_v16 = vadd.f32 %v2325_v3, %v3235_v2 }
 0x25f   : > { %v994_v10 = vpop.f32.mrf.mxu1 }
 0x260   : > { %v1081_v9 = vpack.c.bf16 %v1058_v5, %v1057_v4  ;;  %v995_v14 = vadd.f32 %v3235_v2, %v994_v10  ;;  %v1063_v24 = vmax.f32 %v1003_v16, 0.0  ;;  %2436 = vmatpush3.bf16.msra.mxu0 %v2632_v55 }
 0x261   : > { %v2326_v12 = vpop.f32.mrf.mxu1 }
 0x262   : > { %v1006_v15 = vadd.f32 %v2326_v12, %v3235_v2  ;;  %2367 = vmatprep.mubr.bf16.mxu0 %v1081_v9  ;;  %v1061_v21 = vmax.f32 %v995_v14, 0.0 }
 0x263   : > { %v997_v17 = vpop.f32.mrf.mxu1  ;;  %2368 = vmatmul.mubr.bf16.gmra.mxu0 %v1082_v11 }
 0x264   : > { %v998_v18 = vadd.f32 %v3235_v2, %v997_v17  ;;  %v1064_v19 = vmax.f32 %v1006_v15, 0.0 }
 0x265   : > { %v2329_v20 = vpop.f32.mrf.mxu1 }
 0x266   : > { %v1062_v23 = vmax.f32 %v998_v18, 0.0  ;;  %v1084_v28 = vpack.c.bf16 %v1064_v19, %v1063_v24  ;;  %v1019_v32 = vadd.f32 %v2329_v20, %v3235_v2 }
 0x267   : > { %v1010_v25 = vpop.f32.mrf.mxu1 }
 0x268   : > { %v1083_v27 = vpack.c.bf16 %v1062_v23, %v1061_v21  ;;  %v1011_v30 = vadd.f32 %v3235_v2, %v1010_v25  ;;  %v1067_v37 = vmax.f32 %v1019_v32, 0.0 }
 0x269   : > { %v2330_v29 = vpop.f32.mrf.mxu1 }
 0x26a   : > { %v1022_v26 = vadd.f32 %v2330_v29, %v3235_v2  ;;  %2371 = vmatprep.mubr.bf16.mxu0 %v1083_v27  ;;  %v1065_v35 = vmax.f32 %v1011_v30, 0.0 }
 0x26b   : > { %v1013_v33 = vpop.f32.mrf.mxu1  ;;  %2372 = vmatmul.mubr.bf16.gmra.mxu0 %v1084_v28 }
 0x26c   : > { %v1014_v6 = vadd.f32 %v3235_v2, %v1013_v33  ;;  %v1068_v13 = vmax.f32 %v1022_v26, 0.0 }
 0x26d   : > { %v2333_v34 = vpop.f32.mrf.mxu1 }
 0x26e   : > { %v1066_v36 = vmax.f32 %v1014_v6, 0.0  ;;  %v1086_v40 = vpack.c.bf16 %v1068_v13, %v1067_v37  ;;  %v1035_v22 = vadd.f32 %v2333_v34, %v3235_v2 }
 0x26f   : > { %v1026_v38 = vpop.f32.mrf.mxu1 }
 0x270   : > { %v1085_v39 = vpack.c.bf16 %v1066_v36, %v1065_v35  ;;  %v1027_v42 = vadd.f32 %v3235_v2, %v1026_v38  ;;  %v1071_v49 = vmax.f32 %v1035_v22, 0.0 }
 0x271   : > { %v2334_v41 = vpop.f32.mrf.mxu1 }
 0x272   : > { %v1038_v43 = vadd.f32 %v2334_v41, %v3235_v2  ;;  %2375 = vmatprep.mubr.bf16.mxu0 %v1085_v39  ;;  %v1069_v47 = vmax.f32 %v1027_v42, 0.0 }
 0x273   : > { %v1029_v44 = vpop.f32.mrf.mxu1  ;;  %2376 = vmatmul.mubr.bf16.gmra.mxu0 %v1086_v40 }
 0x274   : > { %v1030_v31 = vadd.f32 %v3235_v2, %v1029_v44  ;;  %v1072_v46 = vmax.f32 %v1038_v43, 0.0  ;;  %v2633_v2 = vld [vmem:[#allocation11 + $0x20] sm:$0xff]  }
 0x275   : > { %2437 = vmatprep.subr.bf16.mxu0 %v2633_v2 }
 0x276   : > { %v1070_v48 = vmax.f32 %v1030_v31, 0.0  ;;  %v1088_v51 = vpack.c.bf16 %v1072_v46, %v1071_v49  ;;  %2438 = vmatpush3.bf16.msra.mxu0 %v2633_v2 }
 0x277   : > { %2439 = vmatprep.subr.bf16.mxu0 %v2634_v45 }
 0x278   : > { %v1087_v50 = vpack.c.bf16 %v1070_v48, %v1069_v47 }
 0x27a   : > { %2379 = vmatprep.mubr.bf16.mxu0 %v1087_v50  ;;  %2440 = vmatpush3.bf16.msra.mxu0 %v2634_v45 }
 0x27b   : > { %2380 = vmatmul.mubr.bf16.gmra.mxu0 %v1088_v51  ;;  %2441 = vmatprep.subr.bf16.mxu0 %v2635_v56 }
 0x27e   : > { %2442 = vmatpush3.bf16.msra.mxu0 %v2635_v56 }
 0x27f   : > { %2443 = vmatprep.subr.bf16.mxu0 %v2636_v57 }
 0x282   : > { %2444 = vmatpush3.bf16.msra.mxu0 %v2636_v57 }
 0x303   : > { %v2353_v58 = vpop.f32.mrf.mxu0 }
 0x304   : > { %v1203_v63 = vadd.f32 %v2353_v58, %v3272_v8 }
 0x305   : > { %v1194_v59 = vpop.f32.mrf.mxu0 }
 0x306   : > { %v1195_v61 = vadd.f32 %v3272_v8, %v1194_v59  ;;  %v1323_v10 = vmax.f32 %v1203_v63, 0.0 }
 0x307   : > { %v2354_v60 = vpop.f32.mrf.mxu0 }
 0x308   : > { %v1206_v62 = vadd.f32 %v2354_v60, %v3272_v8  ;;  %v1321_v5 = vmax.f32 %v1195_v61, 0.0 }
 0x309   : > { %v1197_v0 = vpop.f32.mrf.mxu0 }
 0x30a   : > { %v1198_v1 = vadd.f32 %v3272_v8, %v1197_v0  ;;  %v1324_v3 = vmax.f32 %v1206_v62, 0.0 }
 0x30b   : > { %v2357_v4 = vpop.f32.mrf.mxu0 }
 0x30c   : > { %v1322_v7 = vmax.f32 %v1198_v1, 0.0  ;;  %v1354_v12 = vpack.c.bf16 %v1324_v3, %v1323_v10  ;;  %v1219_v17 = vadd.f32 %v2357_v4, %v3272_v8 }
 0x30d   : > { %v1210_v9 = vpop.f32.mrf.mxu0 }
 0x30e   : > { %v1353_v11 = vpack.c.bf16 %v1322_v7, %v1321_v5  ;;  %v1211_v15 = vadd.f32 %v3272_v8, %v1210_v9  ;;  %v1327_v25 = vmax.f32 %v1219_v17, 0.0 }
 0x30f   : > { %v2358_v14 = vpop.f32.mrf.mxu0 }
 0x310   : > { %v1222_v16 = vadd.f32 %v2358_v14, %v3272_v8  ;;  %2399 = vmatprep.mubr.bf16.mxu1 %v1353_v11  ;;  %v1325_v23 = vmax.f32 %v1211_v15, 0.0 }
 0x311   : > { %v1213_v18 = vpop.f32.mrf.mxu0  ;;  %2400 = vmatmul.mubr.bf16.vlgmr.msra.gmra.mxu1 %v1354_v12 }
 0x312   : > { %v1214_v19 = vadd.f32 %v3272_v8, %v1213_v18  ;;  %v1328_v20 = vmax.f32 %v1222_v16, 0.0 }
 0x313   : > { %v2361_v21 = vpop.f32.mrf.mxu0 }
 0x314   : > { %v1326_v24 = vmax.f32 %v1214_v19, 0.0  ;;  %v1356_v29 = vpack.c.bf16 %v1328_v20, %v1327_v25  ;;  %v1235_v33 = vadd.f32 %v2361_v21, %v3272_v8 }
 0x315   : > { %v1226_v27 = vpop.f32.mrf.mxu0 }
 0x316   : > { %v1355_v28 = vpack.c.bf16 %v1326_v24, %v1325_v23  ;;  %v1227_v26 = vadd.f32 %v3272_v8, %v1226_v27  ;;  %v1331_v38 = vmax.f32 %v1235_v33, 0.0 }
 0x317   : > { %v2362_v30 = vpop.f32.mrf.mxu0 }
 0x318   : > { %v1238_v32 = vadd.f32 %v2362_v30, %v3272_v8  ;;  %2403 = vmatprep.mubr.bf16.mxu1 %v1355_v28  ;;  %v1329_v36 = vmax.f32 %v1227_v26, 0.0 }
 0x319   : > { %v1229_v6 = vpop.f32.mrf.mxu0  ;;  %2404 = vmatmul.mubr.bf16.gmra.mxu1 %v1356_v29 }
 0x31a   : > { %v1230_v13 = vadd.f32 %v3272_v8, %v1229_v6  ;;  %v1332_v34 = vmax.f32 %v1238_v32, 0.0 }
 0x31b   : > { %v2365_v35 = vpop.f32.mrf.mxu0 }
 0x31c   : > { %v1330_v37 = vmax.f32 %v1230_v13, 0.0  ;;  %v1358_v41 = vpack.c.bf16 %v1332_v34, %v1331_v38  ;;  %v1251_v44 = vadd.f32 %v2365_v35, %v3272_v8 }
 0x31d   : > { %v1242_v39 = vpop.f32.mrf.mxu0 }
 0x31e   : > { %v1357_v40 = vpack.c.bf16 %v1330_v37, %v1329_v36  ;;  %v1243_v43 = vadd.f32 %v3272_v8, %v1242_v39  ;;  %v1335_v51 = vmax.f32 %v1251_v44, 0.0 }
 0x31f   : > { %v2366_v42 = vpop.f32.mrf.mxu0 }
 0x320   : > { %v1254_v22 = vadd.f32 %v2366_v42, %v3272_v8  ;;  %2407 = vmatprep.mubr.bf16.mxu1 %v1357_v40  ;;  %v1333_v49 = vmax.f32 %v1243_v43, 0.0 }
 0x321   : > { %v1245_v31 = vpop.f32.mrf.mxu0  ;;  %2408 = vmatmul.mubr.bf16.gmra.mxu1 %v1358_v41 }
 0x322   : > { %v1246_v46 = vadd.f32 %v3272_v8, %v1245_v31  ;;  %v1336_v47 = vmax.f32 %v1254_v22, 0.0 }
 0x323   : > { %v2369_v48 = vpop.f32.mrf.mxu0 }
 0x324   : > { %v1334_v50 = vmax.f32 %v1246_v46, 0.0  ;;  %v1360_v54 = vpack.c.bf16 %v1336_v47, %v1335_v51  ;;  %v1267_v56 = vadd.f32 %v2369_v48, %v3272_v8  ;;  %v2637_v46 = vld [vmem:[#allocation11] sm:$0xff]  }
 0x325   : > { %v1258_v52 = vpop.f32.mrf.mxu0  ;;  %2445 = vmatprep.subr.bf16.mxu0 %v2637_v46 }
 0x326   : > { %v1359_v53 = vpack.c.bf16 %v1334_v50, %v1333_v49  ;;  %v1259_v2 = vadd.f32 %v3272_v8, %v1258_v52  ;;  %v1339_v63 = vmax.f32 %v1267_v56, 0.0  ;;  %2446 = vmatpush3.bf16.msra.mxu0 %v2637_v46  ;;  %v3309_v49 = vld [vmem:[%s3474_s8] ss:$0 sm:$0xff] }
 0x327   : > { %v2370_v55 = vpop.f32.mrf.mxu0 }
 0x328   : > { %v1270_v45 = vadd.f32 %v2370_v55, %v3272_v8  ;;  %2411 = vmatprep.mubr.bf16.mxu1 %v1359_v53  ;;  %v1337_v61 = vmax.f32 %v1259_v2, 0.0 }
 0x329   : > { %v1261_v57 = vpop.f32.mrf.mxu0  ;;  %2412 = vmatmul.mubr.bf16.gmra.mxu1 %v1360_v54 }
 0x32a   : > { %v1262_v58 = vadd.f32 %v3272_v8, %v1261_v57  ;;  %v1340_v59 = vmax.f32 %v1270_v45, 0.0 }
 0x32b   : > { %v2373_v60 = vpop.f32.mrf.mxu0 }
 0x32c   : > { %v1338_v62 = vmax.f32 %v1262_v58, 0.0  ;;  %v1362_v3 = vpack.c.bf16 %v1340_v59, %v1339_v63  ;;  %v1283_v10 = vadd.f32 %v2373_v60, %v3272_v8 }
 0x32d   : > { %v1274_v0 = vpop.f32.mrf.mxu0 }
 0x32e   : > { %v1361_v1 = vpack.c.bf16 %v1338_v62, %v1337_v61  ;;  %v1275_v5 = vadd.f32 %v3272_v8, %v1274_v0  ;;  %v1343_v17 = vmax.f32 %v1283_v10, 0.0 }
 0x32f   : > { %v2374_v4 = vpop.f32.mrf.mxu0 }
 0x330   : > { %v1286_v7 = vadd.f32 %v2374_v4, %v3272_v8  ;;  %2415 = vmatprep.mubr.bf16.mxu1 %v1361_v1  ;;  %v1341_v15 = vmax.f32 %v1275_v5, 0.0 }
 0x331   : > { %v1277_v9 = vpop.f32.mrf.mxu0  ;;  %2416 = vmatmul.mubr.bf16.gmra.mxu1 %v1362_v3 }
 0x332   : > { %v1278_v11 = vadd.f32 %v3272_v8, %v1277_v9  ;;  %v1344_v12 = vmax.f32 %v1286_v7, 0.0 }
 0x333   : > { %v2377_v14 = vpop.f32.mrf.mxu0 }
 0x334   : > { %v1342_v16 = vmax.f32 %v1278_v11, 0.0  ;;  %v1364_v20 = vpack.c.bf16 %v1344_v12, %v1343_v17  ;;  %v1299_v25 = vadd.f32 %v2377_v14, %v3272_v8 }
 0x335   : > { %v1290_v18 = vpop.f32.mrf.mxu0 }
 0x336   : > { %v1363_v19 = vpack.c.bf16 %v1342_v16, %v1341_v15  ;;  %v1291_v23 = vadd.f32 %v3272_v8, %v1290_v18  ;;  %v1347_v33 = vmax.f32 %v1299_v25, 0.0 }
 0x337   : > { %v2378_v21 = vpop.f32.mrf.mxu0 }
 0x338   : > { %v1302_v24 = vadd.f32 %v2378_v21, %v3272_v8  ;;  %2419 = vmatprep.mubr.bf16.mxu1 %v1363_v19  ;;  %v1345_v26 = vmax.f32 %v1291_v23, 0.0 }
 0x339   : > { %v1293_v27 = vpop.f32.mrf.mxu0  ;;  %2420 = vmatmul.mubr.bf16.gmra.mxu1 %v1364_v20 }
 0x33a   : > { %v1294_v28 = vadd.f32 %v3272_v8, %v1293_v27  ;;  %v1348_v29 = vmax.f32 %v1302_v24, 0.0 }
 0x33b   : > { %v2381_v30 = vpop.f32.mrf.mxu0 }
 0x33c   : > { %v1346_v32 = vmax.f32 %v1294_v28, 0.0  ;;  %v1366_v34 = vpack.c.bf16 %v1348_v29, %v1347_v33  ;;  %v1315_v38 = vadd.f32 %v2381_v30, %v3272_v8 }
 0x33d   : > { %v1306_v6 = vpop.f32.mrf.mxu0 }
 0x33e   : > { %v1365_v13 = vpack.c.bf16 %v1346_v32, %v1345_v26  ;;  %v1307_v36 = vadd.f32 %v3272_v8, %v1306_v6  ;;  %v1351_v22 = vmax.f32 %v1315_v38, 0.0 }
 0x33f   : > { %v2382_v35 = vpop.f32.mrf.mxu0 }
 0x340   : > { %v1318_v37 = vadd.f32 %v2382_v35, %v3272_v8  ;;  %2423 = vmatprep.mubr.bf16.mxu1 %v1365_v13  ;;  %v1349_v42 = vmax.f32 %v1307_v36, 0.0 }
 0x341   : > { %v1309_v39 = vpop.f32.mrf.mxu0  ;;  %2424 = vmatmul.mubr.bf16.gmra.mxu1 %v1366_v34 }
 0x342   : > { %v1310_v40 = vadd.f32 %v3272_v8, %v1309_v39  ;;  %v1352_v41 = vmax.f32 %v1318_v37, 0.0 }
 0x344   : > { %v1350_v43 = vmax.f32 %v1310_v40, 0.0  ;;  %v1368_v31 = vpack.c.bf16 %v1352_v41, %v1351_v22 }
 0x346   : > { %v1367_v44 = vpack.c.bf16 %v1350_v43, %v1349_v42 }
 0x348   : > { %2427 = vmatprep.mubr.bf16.mxu1 %v1367_v44 }
 0x349   : > { %2428 = vmatmul.mubr.bf16.gmra.mxu1 %v1368_v31 }
 0x3d1   : > { %v2401_v47 = vpop.f32.mrf.mxu1 }
 0x3d2   : > { %v1483_v52 = vadd.f32 %v2401_v47, %v3309_v49 }
 0x3d3   : > { %v1474_v48 = vpop.f32.mrf.mxu1 }
 0x3d4   : > { %v1475_v8 = vadd.f32 %v3309_v49, %v1474_v48  ;;  %v1603_v57 = vmax.f32 %v1483_v52, 0.0 }
 0x3d5   : > { %v2402_v50 = vpop.f32.mrf.mxu1 }
 0x3d6   : > { %v1486_v51 = vadd.f32 %v2402_v50, %v3309_v49  ;;  %v1601_v45 = vmax.f32 %v1475_v8, 0.0 }
 0x3d7   : > { %v1477_v53 = vpop.f32.mrf.mxu1 }
 0x3d8   : > { %v1478_v54 = vadd.f32 %v3309_v49, %v1477_v53  ;;  %v1604_v55 = vmax.f32 %v1486_v51, 0.0 }
 0x3d9   : > { %v2405_v2 = vpop.f32.mrf.mxu1 }
 0x3da   : > { %v1602_v56 = vmax.f32 %v1478_v54, 0.0  ;;  %v1634_v60 = vpack.c.bf16 %v1604_v55, %v1603_v57  ;;  %v1499_v0 = vadd.f32 %v2405_v2, %v3309_v49 }
 0x3db   : > { %v1490_v58 = vpop.f32.mrf.mxu1 }
 0x3dc   : > { %v1633_v59 = vpack.c.bf16 %v1602_v56, %v1601_v45  ;;  %v1491_v62 = vadd.f32 %v3309_v49, %v1490_v58  ;;  %v1607_v9 = vmax.f32 %v1499_v0, 0.0 }
 0x3dd   : > { %v2406_v61 = vpop.f32.mrf.mxu1 }
 0x3de   : > { %v1502_v63 = vadd.f32 %v2406_v61, %v3309_v49  ;;  %2447 = vmatprep.mubr.bf16.mxu0 %v1633_v59  ;;  %v1605_v7 = vmax.f32 %v1491_v62, 0.0 }
 0x3df   : > { %v1493_v1 = vpop.f32.mrf.mxu1  ;;  %2448 = vmatmul.mubr.bf16.vlgmr.msra.gmra.mxu0 %v1634_v60 }
 0x3e0   : > { %v1494_v3 = vadd.f32 %v3309_v49, %v1493_v1  ;;  %v1608_v4 = vmax.f32 %v1502_v63, 0.0 }
 0x3e1   : > { %v2409_v5 = vpop.f32.mrf.mxu1 }
 0x3e2   : > { %v1606_v10 = vmax.f32 %v1494_v3, 0.0  ;;  %v1636_v14 = vpack.c.bf16 %v1608_v4, %v1607_v9  ;;  %v1515_v18 = vadd.f32 %v2409_v5, %v3309_v49 }
 0x3e3   : > { %v1506_v11 = vpop.f32.mrf.mxu1 }
 0x3e4   : > { %v1635_v12 = vpack.c.bf16 %v1606_v10, %v1605_v7  ;;  %v1507_v16 = vadd.f32 %v3309_v49, %v1506_v11  ;;  %v1611_v27 = vmax.f32 %v1515_v18, 0.0 }
 0x3e5   : > { %v2410_v15 = vpop.f32.mrf.mxu1 }
 0x3e6   : > { %v1518_v17 = vadd.f32 %v2410_v15, %v3309_v49  ;;  %2451 = vmatprep.mubr.bf16.mxu0 %v1635_v12  ;;  %v1609_v24 = vmax.f32 %v1507_v16, 0.0 }
 0x3e7   : > { %v1509_v19 = vpop.f32.mrf.mxu1  ;;  %2452 = vmatmul.mubr.bf16.gmra.mxu0 %v1636_v14 }
 0x3e8   : > { %v1510_v20 = vadd.f32 %v3309_v49, %v1509_v19  ;;  %v1612_v21 = vmax.f32 %v1518_v17, 0.0 }
 0x3e9   : > { %v2413_v23 = vpop.f32.mrf.mxu1 }
 0x3ea   : > { %v1610_v25 = vmax.f32 %v1510_v20, 0.0  ;;  %v1638_v30 = vpack.c.bf16 %v1612_v21, %v1611_v27  ;;  %v1531_v6 = vadd.f32 %v2413_v23, %v3309_v49 }
 0x3eb   : > { %v1522_v28 = vpop.f32.mrf.mxu1 }
 0x3ec   : > { %v1637_v29 = vpack.c.bf16 %v1610_v25, %v1609_v24  ;;  %v1523_v32 = vadd.f32 %v3309_v49, %v1522_v28  ;;  %v1615_v39 = vmax.f32 %v1531_v6, 0.0 }
 0x3ed   : > { %v2414_v26 = vpop.f32.mrf.mxu1 }
 0x3ee   : > { %v1534_v33 = vadd.f32 %v2414_v26, %v3309_v49  ;;  %2455 = vmatprep.mubr.bf16.mxu0 %v1637_v29  ;;  %v1613_v37 = vmax.f32 %v1523_v32, 0.0 }
 0x3ef   : > { %v1525_v13 = vpop.f32.mrf.mxu1  ;;  %2456 = vmatmul.mubr.bf16.gmra.mxu0 %v1638_v30 }
 0x3f0   : > { %v1526_v34 = vadd.f32 %v3309_v49, %v1525_v13  ;;  %v1616_v35 = vmax.f32 %v1534_v33, 0.0 }
 0x3f1   : > { %v2417_v36 = vpop.f32.mrf.mxu1 }
 0x3f2   : > { %v1614_v38 = vmax.f32 %v1526_v34, 0.0  ;;  %v1640_v42 = vpack.c.bf16 %v1616_v35, %v1615_v39  ;;  %v1547_v31 = vadd.f32 %v2417_v36, %v3309_v49  ;;  %v3346_v34 = vld [vmem:[%s3476_s10] ss:$0 sm:$0xff] }
 0x3f3   : > { %v1538_v40 = vpop.f32.mrf.mxu1 }
 0x3f4   : > { %v1639_v41 = vpack.c.bf16 %v1614_v38, %v1613_v37  ;;  %v1539_v22 = vadd.f32 %v3309_v49, %v1538_v40  ;;  %v1619_v52 = vmax.f32 %v1547_v31, 0.0 }
 0x3f5   : > { %v2418_v43 = vpop.f32.mrf.mxu1 }
 0x3f6   : > { %v1550_v44 = vadd.f32 %v2418_v43, %v3309_v49  ;;  %2459 = vmatprep.mubr.bf16.mxu0 %v1639_v41  ;;  %v1617_v8 = vmax.f32 %v1539_v22, 0.0 }
 0x3f7   : > { %v1541_v46 = vpop.f32.mrf.mxu1  ;;  %2460 = vmatmul.mubr.bf16.gmra.mxu0 %v1640_v42 }
 0x3f8   : > { %v1542_v47 = vadd.f32 %v3309_v49, %v1541_v46  ;;  %v1620_v48 = vmax.f32 %v1550_v44, 0.0 }
 0x3f9   : > { %v2421_v50 = vpop.f32.mrf.mxu1 }
 0x3fa   : > { %v1618_v51 = vmax.f32 %v1542_v47, 0.0  ;;  %v1642_v55 = vpack.c.bf16 %v1620_v48, %v1619_v52  ;;  %v1563_v57 = vadd.f32 %v2421_v50, %v3309_v49 }
 0x3fb   : > { %v1554_v53 = vpop.f32.mrf.mxu1 }
 0x3fc   : > { %v1641_v54 = vpack.c.bf16 %v1618_v51, %v1617_v8  ;;  %v1555_v45 = vadd.f32 %v3309_v49, %v1554_v53  ;;  %v1623_v0 = vmax.f32 %v1563_v57, 0.0 }
 0x3fd   : > { %v2422_v2 = vpop.f32.mrf.mxu1 }
 0x3fe   : > { %v1566_v56 = vadd.f32 %v2422_v2, %v3309_v49  ;;  %2463 = vmatprep.mubr.bf16.mxu0 %v1641_v54  ;;  %v1621_v62 = vmax.f32 %v1555_v45, 0.0 }
 0x3ff   : > { %v1557_v58 = vpop.f32.mrf.mxu1  ;;  %2464 = vmatmul.mubr.bf16.gmra.mxu0 %v1642_v55 }
 0x400   : > { %v1558_v59 = vadd.f32 %v3309_v49, %v1557_v58  ;;  %v1624_v60 = vmax.f32 %v1566_v56, 0.0 }
 0x401   : > { %v2425_v61 = vpop.f32.mrf.mxu1 }
 0x402   : > { %v1622_v63 = vmax.f32 %v1558_v59, 0.0  ;;  %v1644_v4 = vpack.c.bf16 %v1624_v60, %v1623_v0  ;;  %v1579_v9 = vadd.f32 %v2425_v61, %v3309_v49 }
 0x403   : > { %v1570_v1 = vpop.f32.mrf.mxu1 }
 0x404   : > { %v1643_v3 = vpack.c.bf16 %v1622_v63, %v1621_v62  ;;  %v1571_v7 = vadd.f32 %v3309_v49, %v1570_v1  ;;  %v1627_v18 = vmax.f32 %v1579_v9, 0.0 }
 0x405   : > { %v2426_v5 = vpop.f32.mrf.mxu1 }
 0x406   : > { %v1582_v10 = vadd.f32 %v2426_v5, %v3309_v49  ;;  %2467 = vmatprep.mubr.bf16.mxu0 %v1643_v3  ;;  %v1625_v16 = vmax.f32 %v1571_v7, 0.0 }
 0x407   : > { %v1573_v11 = vpop.f32.mrf.mxu1  ;;  %2468 = vmatmul.mubr.bf16.gmra.mxu0 %v1644_v4 }
 0x408   : > { %v1574_v12 = vadd.f32 %v3309_v49, %v1573_v11  ;;  %v1628_v14 = vmax.f32 %v1582_v10, 0.0 }
 0x409   : > { %v2429_v15 = vpop.f32.mrf.mxu1 }
 0x40a   : > { %v1626_v17 = vmax.f32 %v1574_v12, 0.0  ;;  %v1646_v21 = vpack.c.bf16 %v1628_v14, %v1627_v18  ;;  %v1595_v27 = vadd.f32 %v2429_v15, %v3309_v49 }
 0x40b   : > { %v1586_v19 = vpop.f32.mrf.mxu1 }
 0x40c   : > { %v1645_v20 = vpack.c.bf16 %v1626_v17, %v1625_v16  ;;  %v1587_v24 = vadd.f32 %v3309_v49, %v1586_v19  ;;  %v1631_v33 = vmax.f32 %v1595_v27, 0.0 }
 0x40d   : > { %v2430_v23 = vpop.f32.mrf.mxu1 }
 0x40e   : > { %v1598_v25 = vadd.f32 %v2430_v23, %v3309_v49  ;;  %2471 = vmatprep.mubr.bf16.mxu0 %v1645_v20  ;;  %v1629_v26 = vmax.f32 %v1587_v24, 0.0 }
 0x40f   : > { %v1589_v28 = vpop.f32.mrf.mxu1  ;;  %2472 = vmatmul.mubr.bf16.gmra.mxu0 %v1646_v21 }
 0x410   : > { %v1590_v29 = vadd.f32 %v3309_v49, %v1589_v28  ;;  %v1632_v30 = vmax.f32 %v1598_v25, 0.0 }
 0x412   : > { %v1630_v32 = vmax.f32 %v1590_v29, 0.0  ;;  %v1648_v13 = vpack.c.bf16 %v1632_v30, %v1631_v33 }
 0x414   : > { %v1647_v6 = vpack.c.bf16 %v1630_v32, %v1629_v26 }
 0x416   : > { %2475 = vmatprep.mubr.bf16.mxu0 %v1647_v6 }
 0x417   : > { %2476 = vmatmul.mubr.bf16.gmra.mxu0 %v1648_v13 }
 0x49f   : > { %v2449_v35 = vpop.f32.mrf.mxu0 }
 0x4a0   : > { %v1763_v36 = vadd.f32 %v2449_v35, %v3346_v34 }
 0x4a1   : > { %v1754_v37 = vpop.f32.mrf.mxu0 }
 0x4a2   : > { %1883 = vst [vmem:[%s3351_s15 + $0x10] sm:$0xff] %v1763_v36  ;;  %v1755_v49 = vadd.f32 %v3346_v34, %v1754_v37 }
 0x4a3   : > { %v2450_v38 = vpop.f32.mrf.mxu0 }
 0x4a4   : > { %1881 = vst [vmem:[%s3351_s15] sm:$0xff] %v1755_v49  ;;  %v1766_v39 = vadd.f32 %v2450_v38, %v3346_v34 }
 0x4a5   : > { %v1757_v40 = vpop.f32.mrf.mxu0 }
 0x4a6   : > { %1884 = vst [vmem:[%s3351_s15 + $0x18] sm:$0xff] %v1766_v39  ;;  %v1758_v41 = vadd.f32 %v3346_v34, %v1757_v40 }
 0x4a7   : > { %v2453_v42 = vpop.f32.mrf.mxu0 }
 0x4a8   : > { %1882 = vst [vmem:[%s3351_s15 + $0x8] sm:$0xff] %v1758_v41  ;;  %v1779_v43 = vadd.f32 %v2453_v42, %v3346_v34 }
 0x4a9   : > { %v1770_v22 = vpop.f32.mrf.mxu0 }
 0x4aa   : > { %1887 = vst [vmem:[%s3351_s15 + $0x30] sm:$0xff] %v1779_v43  ;;  %v1771_v44 = vadd.f32 %v3346_v34, %v1770_v22 }
 0x4ab   : > { %v2454_v31 = vpop.f32.mrf.mxu0 }
 0x4ac   : > { %1885 = vst [vmem:[%s3351_s15 + $0x20] sm:$0xff] %v1771_v44  ;;  %v1782_v46 = vadd.f32 %v2454_v31, %v3346_v34 }
 0x4ad   : > { %v1773_v47 = vpop.f32.mrf.mxu0 }
 0x4ae   : > { %1888 = vst [vmem:[%s3351_s15 + $0x38] sm:$0xff] %v1782_v46  ;;  %v1774_v48 = vadd.f32 %v3346_v34, %v1773_v47 }
 0x4af   : > { %v2457_v50 = vpop.f32.mrf.mxu0 }
 0x4b0   : > { %1886 = vst [vmem:[%s3351_s15 + $0x28] sm:$0xff] %v1774_v48  ;;  %v1795_v8 = vadd.f32 %v2457_v50, %v3346_v34 }
 0x4b1   : > { %v1786_v51 = vpop.f32.mrf.mxu0 }
 0x4b2   : > { %1891 = vst [vmem:[%s3351_s15 + $0x50] sm:$0xff] %v1795_v8  ;;  %v1787_v52 = vadd.f32 %v3346_v34, %v1786_v51 }
 0x4b3   : > { %v2458_v53 = vpop.f32.mrf.mxu0 }
 0x4b4   : > { %1889 = vst [vmem:[%s3351_s15 + $0x40] sm:$0xff] %v1787_v52  ;;  %v1798_v54 = vadd.f32 %v2458_v53, %v3346_v34 }
 0x4b5   : > { %v1789_v55 = vpop.f32.mrf.mxu0 }
 0x4b6   : > { %1892 = vst [vmem:[%s3351_s15 + $0x58] sm:$0xff] %v1798_v54  ;;  %v1790_v2 = vadd.f32 %v3346_v34, %v1789_v55 }
 0x4b7   : > { %v2461_v45 = vpop.f32.mrf.mxu0 }
 0x4b8   : > { %1890 = vst [vmem:[%s3351_s15 + $0x48] sm:$0xff] %v1790_v2  ;;  %v1811_v56 = vadd.f32 %v2461_v45, %v3346_v34 }
 0x4b9   : > { %v1802_v57 = vpop.f32.mrf.mxu0 }
 0x4ba   : > { %1895 = vst [vmem:[%s3351_s15 + $0x70] sm:$0xff] %v1811_v56  ;;  %v1803_v58 = vadd.f32 %v3346_v34, %v1802_v57 }
 0x4bb   : > { %v2462_v59 = vpop.f32.mrf.mxu0 }
 0x4bc   : > { %1893 = vst [vmem:[%s3351_s15 + $0x60] sm:$0xff] %v1803_v58  ;;  %v1814_v60 = vadd.f32 %v2462_v59, %v3346_v34 }
 0x4bd   : > { %v1805_v61 = vpop.f32.mrf.mxu0 }
 0x4be   : > { %1896 = vst [vmem:[%s3351_s15 + $0x78] sm:$0xff] %v1814_v60  ;;  %v1806_v62 = vadd.f32 %v3346_v34, %v1805_v61 }
 0x4bf   : > { %v2465_v63 = vpop.f32.mrf.mxu0 }
 0x4c0   : > { %1894 = vst [vmem:[%s3351_s15 + $0x68] sm:$0xff] %v1806_v62  ;;  %v1827_v0 = vadd.f32 %v2465_v63, %v3346_v34 }
 0x4c1   : > { %v1818_v1 = vpop.f32.mrf.mxu0 }
 0x4c2   : > { %1899 = vst [vmem:[%s3351_s15 + $0x90] sm:$0xff] %v1827_v0  ;;  %v1819_v3 = vadd.f32 %v3346_v34, %v1818_v1 }
 0x4c3   : > { %v2466_v4 = vpop.f32.mrf.mxu0 }
 0x4c4   : > { %1897 = vst [vmem:[%s3351_s15 + $0x80] sm:$0xff] %v1819_v3  ;;  %v1830_v5 = vadd.f32 %v2466_v4, %v3346_v34 }
 0x4c5   : > { %v1821_v7 = vpop.f32.mrf.mxu0 }
 0x4c6   : > { %1900 = vst [vmem:[%s3351_s15 + $0x98] sm:$0xff] %v1830_v5  ;;  %v1822_v10 = vadd.f32 %v3346_v34, %v1821_v7 }
 0x4c7   : > { %v2469_v9 = vpop.f32.mrf.mxu0 }
 0x4c8   : > { %1898 = vst [vmem:[%s3351_s15 + $0x88] sm:$0xff] %v1822_v10  ;;  %v1843_v11 = vadd.f32 %v2469_v9, %v3346_v34 }
 0x4c9   : > { %v1834_v12 = vpop.f32.mrf.mxu0 }
 0x4ca   : > { %1903 = vst [vmem:[%s3351_s15 + $0xb0] sm:$0xff] %v1843_v11  ;;  %v1835_v14 = vadd.f32 %v3346_v34, %v1834_v12 }
 0x4cb   : > { %v2470_v15 = vpop.f32.mrf.mxu0 }
 0x4cc   : > { %1901 = vst [vmem:[%s3351_s15 + $0xa0] sm:$0xff] %v1835_v14  ;;  %v1846_v16 = vadd.f32 %v2470_v15, %v3346_v34 }
 0x4cd   : > { %v1837_v17 = vpop.f32.mrf.mxu0 }
 0x4ce   : > { %1904 = vst [vmem:[%s3351_s15 + $0xb8] sm:$0xff] %v1846_v16  ;;  %v1838_v18 = vadd.f32 %v3346_v34, %v1837_v17 }
 0x4cf   : > { %v2473_v19 = vpop.f32.mrf.mxu0 }
 0x4d0   : > { %1902 = vst [vmem:[%s3351_s15 + $0xa8] sm:$0xff] %v1838_v18  ;;  %v1859_v20 = vadd.f32 %v2473_v19, %v3346_v34 }
 0x4d1   : > { %v1850_v21 = vpop.f32.mrf.mxu0 }
 0x4d2   : > { %1907 = vst [vmem:[%s3351_s15 + $0xd0] sm:$0xff] %v1859_v20  ;;  %v1851_v23 = vadd.f32 %v3346_v34, %v1850_v21 }
 0x4d3   : > { %v2474_v24 = vpop.f32.mrf.mxu0 }
 0x4d4   : > { %1905 = vst [vmem:[%s3351_s15 + $0xc0] sm:$0xff] %v1851_v23  ;;  %v1862_v25 = vadd.f32 %v2474_v24, %v3346_v34 }
 0x4d5   : > { %v1853_v27 = vpop.f32.mrf.mxu0 }
 0x4d6   : > { %1908 = vst [vmem:[%s3351_s15 + $0xd8] sm:$0xff] %v1862_v25  ;;  %v1854_v28 = vadd.f32 %v3346_v34, %v1853_v27 }
 0x4d7   : > { %v2477_v29 = vpop.f32.mrf.mxu0 }
 0x4d8   : > { %1906 = vst [vmem:[%s3351_s15 + $0xc8] sm:$0xff] %v1854_v28  ;;  %v1875_v30 = vadd.f32 %v2477_v29, %v3346_v34 }
 0x4d9   : > { %v1866_v26 = vpop.f32.mrf.mxu0 }
 0x4da   : > { %1911 = vst [vmem:[%s3351_s15 + $0xf0] sm:$0xff] %v1875_v30  ;;  %v1867_v32 = vadd.f32 %v3346_v34, %v1866_v26 }
 0x4db   : > { %v2478_v33 = vpop.f32.mrf.mxu0 }
 0x4dc   : > { %1909 = vst [vmem:[%s3351_s15 + $0xe0] sm:$0xff] %v1867_v32  ;;  %v1878_v6 = vadd.f32 %v2478_v33, %v3346_v34 }
 0x4dd   : > { %v1869_v13 = vpop.f32.mrf.mxu0 }
 0x4de   : > { %1912 = vst [vmem:[%s3351_s15 + $0xf8] sm:$0xff] %v1878_v6  ;;  %v1870_v35 = vadd.f32 %v3346_v34, %v1869_v13 }
 0x4e0   : > { %1910 = vst [vmem:[%s3351_s15 + $0xe8] sm:$0xff] %v1870_v35 }
 0x4e1   : > { %2809 = shalt.err (!%p2806_p3)
}
 0x4e2   : > { %s2810_s21 = scalar_lea.hbm %s3418_s3, 4096  ;;  %s2814_s5 = scalar_lea.hbm %s3477_s11, 8192 }
 0x4e3   : > { %p2811_p4 = scmp.ne.s32.totalorder %s3418_s3, %s2810_s21  ;;  %p2815_p2 = scmp.lt.s32.totalorder %s3418_s3, %s3477_s11 }
 0x4e4   : > { %p2816_p7 = scmp.lt.s32.totalorder %s2814_s5, %s2810_s21 }
 0x4e5   : > { %p2812_p12 = pnand %p2811_p4, %p3507_p11 }
 0x4e6   : > { %p2817_p8 = por %p2816_p7, %p2815_p2 }
 0x4e7   : > { %p2813_p6 = pneg %p2812_p12 }
 0x4e9   : > { %p2818_p10 = pnand %p2817_p8, %p2813_p6 }
 0x4eb   : > { %2821 = shalt.err (!%p2818_p10)
}
 0x4ec   : > { %s2885_s26 = smov 128   ;;  %s2886_s1 = smov 8  }
 0x4ed   : > { %2517 = dma.vmem_to_hbm [thread:$0]  (%p3507_p11), %s3420_s22, 4096, %s3418_s3, %s1914_s23, %s2885_s26, %s2885_s26, %s2886_s1  }
 0x4ee PF: > { %s1942_s24 = sand.u32 1, %s2860_s17   ;;  %p3508_p0 = scmp.ne.s32.totalorder %s3497_s25, 0 }
 0x4ef   : > { %p3509_p13 = scmp.ge.s32.totalorder %s2872_s20, 2  ;;  %s1943_s29 = scalar_lea.sflag [#allocation4], %s1942_s24 }
 0x4f1   : > { %p2540_p5 = pnand %p3509_p13, %p3508_p0 }
 0x4f3   : > { %p2541_p9 = pneg %p2540_p5 }
 0x4f5   : > { %2855 = dma.done.wait (%p2541_p9), %s1943_s29, 4096  }
 0x4f6   : > { %2857 = vsyncadd (%p2541_p9), %s1943_s29, 4294963200  ;;  %p27_p1 = scmp.ge.s32.totalorder %s3058_s30, 4   ;;  %s3510_s17 = smov %s2864_s18 }
 0x4f7   : > { %s3511_s18 = smov %s2868_s19  ;;  %s3512_s19 = smov %s3070_s28 }
 0x4f8   : > { %s3513_s20 = smov %s3058_s30  ;;  %29 = sbr.rel (!%p27_p1) target bundleno = 14 (0xe), region = 129 }
 0x4fd   :  { %1948 = vsyncpa [#allocation3], 1 }
 0x4fe   :  { %1950 = vsyncpa [#allocation3 + $0x1], 1 }
 0x4ff   :  { %1951 = vsyncpa [#allocation6], 1 }
 0x500   :  { %1952 = vsyncpa [#allocation9], 1 }
 0x501   :  { %1953 = vsyncpa [#allocation12], 1 }
 0x502   :  { %1954 = vsyncpa [#allocation4], 1 }
 0x503   :  { %1956 = vsyncpa [#allocation4 + $0x1], 1 }

</bundles_post_ra>
